<compile_context>
chip_gen: v6e
topology: v6e:2x2x1
jax: 0.10.0
libtpu: 0.0.40
codegen_flags: <defaults>
</compile_context>

<pallas_src>
import functools

import numpy as np
import jax
import jax.numpy as jnp
from jax import lax
from jax.experimental import pallas as pl
from jax.experimental.pallas import tpu as pltpu


# --------------------------------------------------------------------------
# Pallas kernel
# --------------------------------------------------------------------------
def _fractal_stats_kernel(scales_ref, lens_ref, x_ref, pool_ref, out_ref, *,
                          n_scales, n_points, n_feats, min_scale, max_scale,
                          block_w):
    f32 = jnp.float32
    N, D, W = n_points, n_feats, block_w
    inv_total = 1.0 / float(N * D)

    x = x_ref[...].astype(f32)                                   # (N, D) in VMEM

    # ---------------- Phase A: box-counting counts (all scales) --------------
    # mean(avg_pool1d(x, s, s)) == mean(x[:, :L*s]), so one column-sum of x
    # serves every scale's threshold (fused pmean reduction, no per-scale
    # reduce over the pooled tensor).
    col_sum = jnp.sum(x, axis=0, keepdims=True)                  # (1, D)
    d_iota = lax.broadcasted_iota(jnp.int32, (1, D), 1)          # feature/lane ids
    w_iota = lax.broadcasted_iota(jnp.int32, (N, W), 1)          # hoisted lane ids

    for i in range(n_scales):
        s = scales_ref[i]                                        # dynamic int32 scale
        s_idx = s - min_scale
        L = lens_ref[s_idx]                                      # D // s (host-built table)
        s_f = s.astype(f32)
        L_f = L.astype(f32)
        pmean = (jnp.sum(jnp.where(d_iota < L * s, col_sum, 0.0))
                 / (f32(N) * L_f * s_f))
        # (D, W) lane-padded avg-pool mask with 1/s baked in; dynamic leading
        # index keeps the slice 128-lane aligned (padding columns are zero).
        pooled = lax.dot_general(x, pool_ref[s_idx], (((1,), (0,)), ((), ())),
                                 preferred_element_type=f32)     # (N, W)
        hit = jnp.logical_and(pooled > pmean, w_iota < L)        # mask padding lanes
        out_ref[0, i] = jnp.sum(hit.astype(f32))

    # ---------------- Phase B: correlation counts (all scales) ---------------
    x2 = x * x
    sq_col = jnp.sum(x2, axis=1, keepdims=True)                  # (N, 1)
    sq_row = jnp.sum(x2, axis=1)[None, :]                        # (1, N); no degenerate MXU op
    gram = lax.dot_general(x, x, (((1,), (1,)), ((), ())),
                           preferred_element_type=f32)           # (N, N)
    d2 = jnp.maximum(sq_col + sq_row - 2.0 * gram, 0.0)          # live only in this phase
    # torch.cdist diagonal is 0 < scale, so self-pairs are intentionally
    # counted (matches the reference).  All n_scales compares are adjacent so
    # d2 is streamed once with scalar thresholds.
    for i in range(n_scales):
        thr = (scales_ref[i] * scales_ref[i]).astype(f32)        # compare d^2 < s^2
        out_ref[1, i] = jnp.sum((d2 < thr).astype(f32))

    # ---------------- Phase C: information dimension (all scales) ------------
    xmin = jnp.min(x)
    xmax = jnp.max(x)
    rng = xmax - xmin
    xmin_eff = jnp.where(rng > 0.0, xmin, xmin - 1.0)            # torch.histc min==max widening
    inv_rng = 1.0 / jnp.where(rng > 0.0, rng, 2.0)
    t = (x - xmin_eff) * inv_rng                                  # (N, D) in [0, 1]
    log_total = jnp.log(f32(N * D))
    for i in range(n_scales):
        s_f = scales_ref[i].astype(f32)
        bin_id = jnp.clip(jnp.floor(t * s_f), 0.0, s_f - 1.0)     # (N, D) bin ids

        def bin_body(b, acc, _bin_id=bin_id):
            c = jnp.sum((_bin_id == b.astype(f32)).astype(f32))
            return acc + jnp.where(c > 0.0, c * jnp.log(jnp.maximum(c, 1.0)), 0.0)

        # Rolled loop over max_scale bins; bins >= s are empty and add 0.
        c_log_c = lax.fori_loop(0, max_scale, bin_body, f32(0.0))
        # H = -sum p log p = log(total) - sum(c log c) / total
        out_ref[2, i] = log_total - c_log_c * inv_total


# --------------------------------------------------------------------------
# Host-side builders
# --------------------------------------------------------------------------
def _build_pool_masks(n_feats, min_scale, max_scale):
    """Avg-pool masks for every possible integer scale, lane-padded to 128."""
    n_all = max_scale - min_scale + 1
    max_l = max(1, n_feats // min_scale)
    block_w = max(128, ((max_l + 127) // 128) * 128)
    masks = np.zeros((n_all, n_feats, block_w), np.float32)
    lens = np.zeros((n_all,), np.int32)
    for k in range(n_all):
        s = k + min_scale
        L = n_feats // s                      # ceil_mode=False: drop partial window
        lens[k] = L
        for l in range(L):
            masks[k, l * s:(l + 1) * s, l] = 1.0 / float(s)
    return masks, lens, block_w


def _vmem_budget_bytes():
    """Generation-aware VMEM budget (~75% of physical: 48 MiB v7x, 96 MiB v5e/v6e)."""
    try:
        cap = int(pltpu.get_tpu_info().vmem_capacity_bytes)
    except Exception:
        cap = 128 * 1024 * 1024
    return (cap * 3) // 4


@functools.lru_cache(maxsize=16)
def _build_fractal_stats(n_points, n_feats, min_scale, max_scale, n_scales):
    """Build (and cache) ONE compiled pallas_call per (N, D) shape."""
    masks_np, lens_np, block_w = _build_pool_masks(n_feats, min_scale, max_scale)
    n_all = masks_np.shape[0]
    N, D, W = n_points, n_feats, block_w

    kern = functools.partial(
        _fractal_stats_kernel,
        n_scales=n_scales, n_points=N, n_feats=D,
        min_scale=min_scale, max_scale=max_scale, block_w=W)

    # Resident f32 working set (phases do not stack thanks to phase ordering).
    est_bytes = 4 * (
        4 * N * D                 # x, x2 / t, bin_id, elementwise temps
        + 3 * N * N               # gram, d2, compare temp
        + n_all * D * W           # all per-scale pooling masks
        + 4 * N * W               # pooled block, lane iota, compare temps
    ) + (4 << 20)
    budget = _vmem_budget_bytes()
    if est_bytes > budget:
        # TODO(synk): tiled (row, col) grid path for the N^2 term (with
        # "parallel" dimension_semantics to use v7x's 2 TensorCores) once N is
        # large enough that the resident working set no longer fits in VMEM.
        raise NotImplementedError(
            f"fractal-stats working set ({est_bytes} B) exceeds the VMEM "
            f"budget ({budget} B); a tiled grid path is required at this size.")
    vmem_limit = int(min(max(est_bytes, 16 * 1024 * 1024), budget))

    call = pl.pallas_call(
        kern,
        out_shape=jax.ShapeDtypeStruct((3, n_scales), jnp.float32),
        in_specs=[pl.BlockSpec(memory_space=pltpu.MemorySpace.SMEM),   # scales (int32)
                  pl.BlockSpec(memory_space=pltpu.MemorySpace.SMEM),   # L = D//s table
                  pl.BlockSpec(memory_space=pltpu.MemorySpace.VMEM),   # x
                  pl.BlockSpec(memory_space=pltpu.MemorySpace.VMEM)],  # pool masks
        out_specs=pl.BlockSpec(memory_space=pltpu.MemorySpace.SMEM),
        compiler_params=pltpu.CompilerParams(vmem_limit_bytes=vmem_limit),
    )

    pool_masks = jnp.asarray(masks_np)
    lens = jnp.asarray(lens_np)

    @jax.jit
    def run(scales_i32, x):
        return call(scales_i32.astype(jnp.int32), lens,
                    x.astype(jnp.float32), pool_masks)

    return run


def fractal_stats(x, scales_i32, min_scale, max_scale):
    """Run the Pallas kernel; returns (3, n_scales) f32 raw statistics."""
    N, D = x.shape
    run = _build_fractal_stats(int(N), int(D), int(min_scale), int(max_scale),
                               int(scales_i32.shape[0]))
    return run(scales_i32, x)


# --------------------------------------------------------------------------
# Module wrapper (parameters initialized exactly as in the PyTorch __init__)
# --------------------------------------------------------------------------
class AdaptiveFractalAnalysisPallas:
    def __init__(self, input_dim, min_scale=2, max_scale=16, n_scales=5):
        self.input_dim = input_dim
        self.min_scale = min_scale
        self.max_scale = max_scale
        self.n_scales = n_scales
        self.scale_params = jnp.linspace(
            np.log(min_scale), np.log(max_scale), n_scales).astype(jnp.float32)
        self.scale_importance = jnp.ones((n_scales,), jnp.float32)

    def _compute_dynamic_scales(self, x):
        """Dynamic integer scales, computed and truncated entirely on device."""
        scales = jnp.exp(self.scale_params)
        mean = jnp.mean(x)
        std = jnp.std(x, ddof=1)                      # torch.std is unbiased
        factor = std / mean
        # mean(x) == 0 makes torch crash at int(NaN); sanitize to a neutral 1.0.
        factor = jnp.where(jnp.isfinite(factor), factor, jnp.float32(1.0))
        adjusted = scales * jnp.clip(factor, 0.5, 2.0)
        adjusted = jnp.clip(adjusted, self.min_scale, self.max_scale)
        return adjusted.astype(jnp.int32)             # trunc-toward-zero == int(s.item())

    @staticmethod
    def _polyfit_slope(xv, yv):
        xm = jnp.mean(xv)
        ym = jnp.mean(yv)
        return jnp.sum((xv - xm) * (yv - ym)) / jnp.sum((xv - xm) ** 2)

    def __call__(self, x, return_scales=False):
        scales_i = self._compute_dynamic_scales(x)            # (n_scales,) int32, on device
        stats = fractal_stats(x, scales_i, self.min_scale, self.max_scale)
        log_scales = jnp.log(scales_i.astype(jnp.float32))

        # Clamp counts >= 1 so degenerate inputs don't poison the fit with -inf.
        box_dim = -self._polyfit_slope(log_scales, jnp.log(jnp.maximum(stats[0], 1.0)))
        corr_dim = self._polyfit_slope(log_scales, jnp.log(jnp.maximum(stats[1], 1.0)))
        info_dim = self._polyfit_slope(log_scales, stats[2])

        weights = jax.nn.softmax(self.scale_importance, axis=0)
        combined = (weights[0] * box_dim
                    + weights[1] * corr_dim
                    + weights[2] * info_dim)
        if return_scales:
            # Only this path needs a device->host sync (torch returns List[int]).
            return combined, [int(v) for v in np.asarray(jax.device_get(scales_i))]
        return combined


if __name__ == "__main__":
    key = jax.random.PRNGKey(0)
    # x: [N, D] = 8 sample points x 64 features
    x = jax.random.uniform(key, (8, 64), dtype=jnp.float32)

    model = AdaptiveFractalAnalysisPallas(input_dim=64)
    out = model(x)
    jax.block_until_ready(out)
    print("KERNEL_OK")
</pallas_src>

<mosaic_0001>
module attributes {stable_mosaic.version = 11 : i64} {
  func.func @_fractal_stats_kernel(%arg0: memref<5xi32, #tpu.memory_space<smem>>, %arg1: memref<15xi32, #tpu.memory_space<smem>>, %arg2: memref<8x64xf32, #tpu.memory_space<vmem>>, %arg3: memref<15x64x128xf32, #tpu.memory_space<vmem>>, %arg4: memref<3x5xf32, #tpu.memory_space<smem>>) attributes {dimension_semantics = [], scalar_prefetch = 0 : i64, scratch_operands = 0 : i64, tpu.core_type = #tpu.core_type<tc>} {
    %c0 = arith.constant 0 : index
    %c0_0 = arith.constant 0 : index
    %0 = vector.load %arg2[%c0, %c0_0] : memref<8x64xf32, #tpu.memory_space<vmem>>, vector<8x64xf32>
    %cst = arith.constant dense<0.000000e+00> : vector<64xf32>
    %1 = vector.multi_reduction <add>, %0, %cst [0] : vector<8x64xf32> to vector<64xf32>
    %2 = vector.shape_cast %1 : vector<64xf32> to vector<1x64xf32>
    %3 = tpu.iota {dimensions = array<i32: 1>} : vector<1x64xi32>
    %4 = tpu.iota {dimensions = array<i32: 1>} : vector<8x128xi32>
    %c0_1 = arith.constant 0 : index
    %5 = memref.load %arg0[%c0_1] : memref<5xi32, #tpu.memory_space<smem>>
    %c2_i32 = arith.constant 2 : i32
    %6 = arith.subi %5, %c2_i32 : i32
    %7 = arith.index_cast %6 : i32 to index
    %8 = memref.load %arg1[%7] : memref<15xi32, #tpu.memory_space<smem>>
    %9 = arith.sitofp %5 : i32 to f32
    %10 = arith.sitofp %8 : i32 to f32
    %11 = arith.muli %8, %5 : i32
    %12 = vector.broadcast %11 : i32 to vector<1x64xi32>
    %13 = arith.cmpi slt, %3, %12 : vector<1x64xi32>
    %cst_2 = arith.constant 0.000000e+00 : f32
    %14 = vector.broadcast %cst_2 : f32 to vector<1x64xf32>
    %15 = arith.select %13, %2, %14 : vector<1x64xi1>, vector<1x64xf32>
    %16 = vector.shape_cast %15 : vector<1x64xf32> to vector<1x1x64xf32>
    %cst_3 = arith.constant dense<0.000000e+00> : vector<1xf32>
    %17 = vector.multi_reduction <add>, %16, %cst_3 [1, 2] : vector<1x1x64xf32> to vector<1xf32>
    %18 = vector.shape_cast %17 : vector<1xf32> to vector<1x1x1xf32>
    %19 = vector.extract %18[0, 0, 0] : f32 from vector<1x1x1xf32>
    %cst_4 = arith.constant 8.000000e+00 : f32
    %20 = arith.mulf %cst_4, %10 : f32
    %21 = arith.mulf %20, %9 : f32
    %22 = arith.divf %19, %21 : f32
    %23 = arith.index_cast %6 : i32 to index
    %c0_5 = arith.constant 0 : index
    %c0_6 = arith.constant 0 : index
    %24 = vector.load %arg3[%23, %c0_5, %c0_6] : memref<15x64x128xf32, #tpu.memory_space<vmem>>, vector<1x64x128xf32>
    %25 = vector.shape_cast %24 : vector<1x64x128xf32> to vector<64x128xf32>
    %cst_7 = arith.constant dense<0.000000e+00> : vector<8x128xf32>
    %26 = tpu.matmul %0, %25, %cst_7 {dimension_numbers = #tpu.dot_dimension_numbers<[1], [0], [0], [1], [0, 0, 1, 1], [], []>} : vector<8x64xf32>, vector<64x128xf32>, vector<8x128xf32> -> vector<8x128xf32>
    %27 = vector.broadcast %22 : f32 to vector<8x128xf32>
    %28 = arith.cmpf ogt, %26, %27 : vector<8x128xf32>
    %29 = vector.broadcast %8 : i32 to vector<8x128xi32>
    %30 = arith.cmpi slt, %4, %29 : vector<8x128xi32>
    %31 = arith.andi %28, %30 : vector<8x128xi1>
    %32 = arith.extui %31 : vector<8x128xi1> to vector<8x128xi32>
    %33 = arith.sitofp %32 : vector<8x128xi32> to vector<8x128xf32>
    %34 = vector.shape_cast %33 : vector<8x128xf32> to vector<1x8x128xf32>
    %cst_8 = arith.constant dense<0.000000e+00> : vector<1xf32>
    %35 = vector.multi_reduction <add>, %34, %cst_8 [1, 2] : vector<1x8x128xf32> to vector<1xf32>
    %36 = vector.shape_cast %35 : vector<1xf32> to vector<1x1x1xf32>
    %37 = vector.extract %36[0, 0, 0] : f32 from vector<1x1x1xf32>
    %c0_9 = arith.constant 0 : index
    %c0_10 = arith.constant 0 : index
    %38 = memref.load %arg4[%c0_9, %c0_10] : memref<3x5xf32, #tpu.memory_space<smem>>
    memref.store %37, %arg4[%c0_9, %c0_10] : memref<3x5xf32, #tpu.memory_space<smem>>
    %c1 = arith.constant 1 : index
    %39 = memref.load %arg0[%c1] : memref<5xi32, #tpu.memory_space<smem>>
    %c2_i32_11 = arith.constant 2 : i32
    %40 = arith.subi %39, %c2_i32_11 : i32
    %41 = arith.index_cast %40 : i32 to index
    %42 = memref.load %arg1[%41] : memref<15xi32, #tpu.memory_space<smem>>
    %43 = arith.sitofp %39 : i32 to f32
    %44 = arith.sitofp %42 : i32 to f32
    %45 = arith.muli %42, %39 : i32
    %46 = vector.broadcast %45 : i32 to vector<1x64xi32>
    %47 = arith.cmpi slt, %3, %46 : vector<1x64xi32>
    %cst_12 = arith.constant 0.000000e+00 : f32
    %48 = vector.broadcast %cst_12 : f32 to vector<1x64xf32>
    %49 = arith.select %47, %2, %48 : vector<1x64xi1>, vector<1x64xf32>
    %50 = vector.shape_cast %49 : vector<1x64xf32> to vector<1x1x64xf32>
    %cst_13 = arith.constant dense<0.000000e+00> : vector<1xf32>
    %51 = vector.multi_reduction <add>, %50, %cst_13 [1, 2] : vector<1x1x64xf32> to vector<1xf32>
    %52 = vector.shape_cast %51 : vector<1xf32> to vector<1x1x1xf32>
    %53 = vector.extract %52[0, 0, 0] : f32 from vector<1x1x1xf32>
    %cst_14 = arith.constant 8.000000e+00 : f32
    %54 = arith.mulf %cst_14, %44 : f32
    %55 = arith.mulf %54, %43 : f32
    %56 = arith.divf %53, %55 : f32
    %57 = arith.index_cast %40 : i32 to index
    %c0_15 = arith.constant 0 : index
    %c0_16 = arith.constant 0 : index
    %58 = vector.load %arg3[%57, %c0_15, %c0_16] : memref<15x64x128xf32, #tpu.memory_space<vmem>>, vector<1x64x128xf32>
    %59 = vector.shape_cast %58 : vector<1x64x128xf32> to vector<64x128xf32>
    %cst_17 = arith.constant dense<0.000000e+00> : vector<8x128xf32>
    %60 = tpu.matmul %0, %59, %cst_17 {dimension_numbers = #tpu.dot_dimension_numbers<[1], [0], [0], [1], [0, 0, 1, 1], [], []>} : vector<8x64xf32>, vector<64x128xf32>, vector<8x128xf32> -> vector<8x128xf32>
    %61 = vector.broadcast %56 : f32 to vector<8x128xf32>
    %62 = arith.cmpf ogt, %60, %61 : vector<8x128xf32>
    %63 = vector.broadcast %42 : i32 to vector<8x128xi32>
    %64 = arith.cmpi slt, %4, %63 : vector<8x128xi32>
    %65 = arith.andi %62, %64 : vector<8x128xi1>
    %66 = arith.extui %65 : vector<8x128xi1> to vector<8x128xi32>
    %67 = arith.sitofp %66 : vector<8x128xi32> to vector<8x128xf32>
    %68 = vector.shape_cast %67 : vector<8x128xf32> to vector<1x8x128xf32>
    %cst_18 = arith.constant dense<0.000000e+00> : vector<1xf32>
    %69 = vector.multi_reduction <add>, %68, %cst_18 [1, 2] : vector<1x8x128xf32> to vector<1xf32>
    %70 = vector.shape_cast %69 : vector<1xf32> to vector<1x1x1xf32>
    %71 = vector.extract %70[0, 0, 0] : f32 from vector<1x1x1xf32>
    %c0_19 = arith.constant 0 : index
    %c1_20 = arith.constant 1 : index
    %72 = memref.load %arg4[%c0_19, %c1_20] : memref<3x5xf32, #tpu.memory_space<smem>>
    memref.store %71, %arg4[%c0_19, %c1_20] : memref<3x5xf32, #tpu.memory_space<smem>>
    %c2 = arith.constant 2 : index
    %73 = memref.load %arg0[%c2] : memref<5xi32, #tpu.memory_space<smem>>
    %c2_i32_21 = arith.constant 2 : i32
    %74 = arith.subi %73, %c2_i32_21 : i32
    %75 = arith.index_cast %74 : i32 to index
    %76 = memref.load %arg1[%75] : memref<15xi32, #tpu.memory_space<smem>>
    %77 = arith.sitofp %73 : i32 to f32
    %78 = arith.sitofp %76 : i32 to f32
    %79 = arith.muli %76, %73 : i32
    %80 = vector.broadcast %79 : i32 to vector<1x64xi32>
    %81 = arith.cmpi slt, %3, %80 : vector<1x64xi32>
    %cst_22 = arith.constant 0.000000e+00 : f32
    %82 = vector.broadcast %cst_22 : f32 to vector<1x64xf32>
    %83 = arith.select %81, %2, %82 : vector<1x64xi1>, vector<1x64xf32>
    %84 = vector.shape_cast %83 : vector<1x64xf32> to vector<1x1x64xf32>
    %cst_23 = arith.constant dense<0.000000e+00> : vector<1xf32>
    %85 = vector.multi_reduction <add>, %84, %cst_23 [1, 2] : vector<1x1x64xf32> to vector<1xf32>
    %86 = vector.shape_cast %85 : vector<1xf32> to vector<1x1x1xf32>
    %87 = vector.extract %86[0, 0, 0] : f32 from vector<1x1x1xf32>
    %cst_24 = arith.constant 8.000000e+00 : f32
    %88 = arith.mulf %cst_24, %78 : f32
    %89 = arith.mulf %88, %77 : f32
    %90 = arith.divf %87, %89 : f32
    %91 = arith.index_cast %74 : i32 to index
    %c0_25 = arith.constant 0 : index
    %c0_26 = arith.constant 0 : index
    %92 = vector.load %arg3[%91, %c0_25, %c0_26] : memref<15x64x128xf32, #tpu.memory_space<vmem>>, vector<1x64x128xf32>
    %93 = vector.shape_cast %92 : vector<1x64x128xf32> to vector<64x128xf32>
    %cst_27 = arith.constant dense<0.000000e+00> : vector<8x128xf32>
    %94 = tpu.matmul %0, %93, %cst_27 {dimension_numbers = #tpu.dot_dimension_numbers<[1], [0], [0], [1], [0, 0, 1, 1], [], []>} : vector<8x64xf32>, vector<64x128xf32>, vector<8x128xf32> -> vector<8x128xf32>
    %95 = vector.broadcast %90 : f32 to vector<8x128xf32>
    %96 = arith.cmpf ogt, %94, %95 : vector<8x128xf32>
    %97 = vector.broadcast %76 : i32 to vector<8x128xi32>
    %98 = arith.cmpi slt, %4, %97 : vector<8x128xi32>
    %99 = arith.andi %96, %98 : vector<8x128xi1>
    %100 = arith.extui %99 : vector<8x128xi1> to vector<8x128xi32>
    %101 = arith.sitofp %100 : vector<8x128xi32> to vector<8x128xf32>
    %102 = vector.shape_cast %101 : vector<8x128xf32> to vector<1x8x128xf32>
    %cst_28 = arith.constant dense<0.000000e+00> : vector<1xf32>
    %103 = vector.multi_reduction <add>, %102, %cst_28 [1, 2] : vector<1x8x128xf32> to vector<1xf32>
    %104 = vector.shape_cast %103 : vector<1xf32> to vector<1x1x1xf32>
    %105 = vector.extract %104[0, 0, 0] : f32 from vector<1x1x1xf32>
    %c0_29 = arith.constant 0 : index
    %c2_30 = arith.constant 2 : index
    %106 = memref.load %arg4[%c0_29, %c2_30] : memref<3x5xf32, #tpu.memory_space<smem>>
    memref.store %105, %arg4[%c0_29, %c2_30] : memref<3x5xf32, #tpu.memory_space<smem>>
    %c3 = arith.constant 3 : index
    %107 = memref.load %arg0[%c3] : memref<5xi32, #tpu.memory_space<smem>>
    %c2_i32_31 = arith.constant 2 : i32
    %108 = arith.subi %107, %c2_i32_31 : i32
    %109 = arith.index_cast %108 : i32 to index
    %110 = memref.load %arg1[%109] : memref<15xi32, #tpu.memory_space<smem>>
    %111 = arith.sitofp %107 : i32 to f32
    %112 = arith.sitofp %110 : i32 to f32
    %113 = arith.muli %110, %107 : i32
    %114 = vector.broadcast %113 : i32 to vector<1x64xi32>
    %115 = arith.cmpi slt, %3, %114 : vector<1x64xi32>
    %cst_32 = arith.constant 0.000000e+00 : f32
    %116 = vector.broadcast %cst_32 : f32 to vector<1x64xf32>
    %117 = arith.select %115, %2, %116 : vector<1x64xi1>, vector<1x64xf32>
    %118 = vector.shape_cast %117 : vector<1x64xf32> to vector<1x1x64xf32>
    %cst_33 = arith.constant dense<0.000000e+00> : vector<1xf32>
    %119 = vector.multi_reduction <add>, %118, %cst_33 [1, 2] : vector<1x1x64xf32> to vector<1xf32>
    %120 = vector.shape_cast %119 : vector<1xf32> to vector<1x1x1xf32>
    %121 = vector.extract %120[0, 0, 0] : f32 from vector<1x1x1xf32>
    %cst_34 = arith.constant 8.000000e+00 : f32
    %122 = arith.mulf %cst_34, %112 : f32
    %123 = arith.mulf %122, %111 : f32
    %124 = arith.divf %121, %123 : f32
    %125 = arith.index_cast %108 : i32 to index
    %c0_35 = arith.constant 0 : index
    %c0_36 = arith.constant 0 : index
    %126 = vector.load %arg3[%125, %c0_35, %c0_36] : memref<15x64x128xf32, #tpu.memory_space<vmem>>, vector<1x64x128xf32>
    %127 = vector.shape_cast %126 : vector<1x64x128xf32> to vector<64x128xf32>
    %cst_37 = arith.constant dense<0.000000e+00> : vector<8x128xf32>
    %128 = tpu.matmul %0, %127, %cst_37 {dimension_numbers = #tpu.dot_dimension_numbers<[1], [0], [0], [1], [0, 0, 1, 1], [], []>} : vector<8x64xf32>, vector<64x128xf32>, vector<8x128xf32> -> vector<8x128xf32>
    %129 = vector.broadcast %124 : f32 to vector<8x128xf32>
    %130 = arith.cmpf ogt, %128, %129 : vector<8x128xf32>
    %131 = vector.broadcast %110 : i32 to vector<8x128xi32>
    %132 = arith.cmpi slt, %4, %131 : vector<8x128xi32>
    %133 = arith.andi %130, %132 : vector<8x128xi1>
    %134 = arith.extui %133 : vector<8x128xi1> to vector<8x128xi32>
    %135 = arith.sitofp %134 : vector<8x128xi32> to vector<8x128xf32>
    %136 = vector.shape_cast %135 : vector<8x128xf32> to vector<1x8x128xf32>
    %cst_38 = arith.constant dense<0.000000e+00> : vector<1xf32>
    %137 = vector.multi_reduction <add>, %136, %cst_38 [1, 2] : vector<1x8x128xf32> to vector<1xf32>
    %138 = vector.shape_cast %137 : vector<1xf32> to vector<1x1x1xf32>
    %139 = vector.extract %138[0, 0, 0] : f32 from vector<1x1x1xf32>
    %c0_39 = arith.constant 0 : index
    %c3_40 = arith.constant 3 : index
    %140 = memref.load %arg4[%c0_39, %c3_40] : memref<3x5xf32, #tpu.memory_space<smem>>
    memref.store %139, %arg4[%c0_39, %c3_40] : memref<3x5xf32, #tpu.memory_space<smem>>
    %c4 = arith.constant 4 : index
    %141 = memref.load %arg0[%c4] : memref<5xi32, #tpu.memory_space<smem>>
    %c2_i32_41 = arith.constant 2 : i32
    %142 = arith.subi %141, %c2_i32_41 : i32
    %143 = arith.index_cast %142 : i32 to index
    %144 = memref.load %arg1[%143] : memref<15xi32, #tpu.memory_space<smem>>
    %145 = arith.sitofp %141 : i32 to f32
    %146 = arith.sitofp %144 : i32 to f32
    %147 = arith.muli %144, %141 : i32
    %148 = vector.broadcast %147 : i32 to vector<1x64xi32>
    %149 = arith.cmpi slt, %3, %148 : vector<1x64xi32>
    %cst_42 = arith.constant 0.000000e+00 : f32
    %150 = vector.broadcast %cst_42 : f32 to vector<1x64xf32>
    %151 = arith.select %149, %2, %150 : vector<1x64xi1>, vector<1x64xf32>
    %152 = vector.shape_cast %151 : vector<1x64xf32> to vector<1x1x64xf32>
    %cst_43 = arith.constant dense<0.000000e+00> : vector<1xf32>
    %153 = vector.multi_reduction <add>, %152, %cst_43 [1, 2] : vector<1x1x64xf32> to vector<1xf32>
    %154 = vector.shape_cast %153 : vector<1xf32> to vector<1x1x1xf32>
    %155 = vector.extract %154[0, 0, 0] : f32 from vector<1x1x1xf32>
    %cst_44 = arith.constant 8.000000e+00 : f32
    %156 = arith.mulf %cst_44, %146 : f32
    %157 = arith.mulf %156, %145 : f32
    %158 = arith.divf %155, %157 : f32
    %159 = arith.index_cast %142 : i32 to index
    %c0_45 = arith.constant 0 : index
    %c0_46 = arith.constant 0 : index
    %160 = vector.load %arg3[%159, %c0_45, %c0_46] : memref<15x64x128xf32, #tpu.memory_space<vmem>>, vector<1x64x128xf32>
    %161 = vector.shape_cast %160 : vector<1x64x128xf32> to vector<64x128xf32>
    %cst_47 = arith.constant dense<0.000000e+00> : vector<8x128xf32>
    %162 = tpu.matmul %0, %161, %cst_47 {dimension_numbers = #tpu.dot_dimension_numbers<[1], [0], [0], [1], [0, 0, 1, 1], [], []>} : vector<8x64xf32>, vector<64x128xf32>, vector<8x128xf32> -> vector<8x128xf32>
    %163 = vector.broadcast %158 : f32 to vector<8x128xf32>
    %164 = arith.cmpf ogt, %162, %163 : vector<8x128xf32>
    %165 = vector.broadcast %144 : i32 to vector<8x128xi32>
    %166 = arith.cmpi slt, %4, %165 : vector<8x128xi32>
    %167 = arith.andi %164, %166 : vector<8x128xi1>
    %168 = arith.extui %167 : vector<8x128xi1> to vector<8x128xi32>
    %169 = arith.sitofp %168 : vector<8x128xi32> to vector<8x128xf32>
    %170 = vector.shape_cast %169 : vector<8x128xf32> to vector<1x8x128xf32>
    %cst_48 = arith.constant dense<0.000000e+00> : vector<1xf32>
    %171 = vector.multi_reduction <add>, %170, %cst_48 [1, 2] : vector<1x8x128xf32> to vector<1xf32>
    %172 = vector.shape_cast %171 : vector<1xf32> to vector<1x1x1xf32>
    %173 = vector.extract %172[0, 0, 0] : f32 from vector<1x1x1xf32>
    %c0_49 = arith.constant 0 : index
    %c4_50 = arith.constant 4 : index
    %174 = memref.load %arg4[%c0_49, %c4_50] : memref<3x5xf32, #tpu.memory_space<smem>>
    memref.store %173, %arg4[%c0_49, %c4_50] : memref<3x5xf32, #tpu.memory_space<smem>>
    %175 = arith.mulf %0, %0 : vector<8x64xf32>
    %cst_51 = arith.constant dense<0.000000e+00> : vector<8xf32>
    %176 = vector.multi_reduction <add>, %175, %cst_51 [1] : vector<8x64xf32> to vector<8xf32>
    %177 = vector.shape_cast %176 : vector<8xf32> to vector<8x1xf32>
    %cst_52 = arith.constant dense<0.000000e+00> : vector<8xf32>
    %178 = vector.multi_reduction <add>, %175, %cst_52 [1] : vector<8x64xf32> to vector<8xf32>
    %179 = vector.shape_cast %178 : vector<8xf32> to vector<1x8xf32>
    %cst_53 = arith.constant dense<0.000000e+00> : vector<8x8xf32>
    %180 = tpu.matmul %0, %0, %cst_53 {dimension_numbers = #tpu.dot_dimension_numbers<[1], [1], [0], [0], [0, 0, 1, 0], [], []>} : vector<8x64xf32>, vector<8x64xf32>, vector<8x8xf32> -> vector<8x8xf32>
    %181 = vector.broadcast %177 : vector<8x1xf32> to vector<8x8xf32>
    %182 = vector.broadcast %179 : vector<1x8xf32> to vector<8x8xf32>
    %183 = arith.addf %181, %182 : vector<8x8xf32>
    %cst_54 = arith.constant 2.000000e+00 : f32
    %184 = vector.broadcast %cst_54 : f32 to vector<8x8xf32>
    %185 = arith.mulf %184, %180 : vector<8x8xf32>
    %186 = arith.subf %183, %185 : vector<8x8xf32>
    %cst_55 = arith.constant 0.000000e+00 : f32
    %187 = vector.broadcast %cst_55 : f32 to vector<8x8xf32>
    %188 = arith.maximumf %186, %187 : vector<8x8xf32>
    %c0_56 = arith.constant 0 : index
    %189 = memref.load %arg0[%c0_56] : memref<5xi32, #tpu.memory_space<smem>>
    %c0_57 = arith.constant 0 : index
    %190 = memref.load %arg0[%c0_57] : memref<5xi32, #tpu.memory_space<smem>>
    %191 = arith.muli %189, %190 : i32
    %192 = arith.sitofp %191 : i32 to f32
    %193 = vector.broadcast %192 : f32 to vector<8x8xf32>
    %194 = arith.cmpf olt, %188, %193 : vector<8x8xf32>
    %195 = arith.extui %194 : vector<8x8xi1> to vector<8x8xi32>
    %196 = arith.sitofp %195 : vector<8x8xi32> to vector<8x8xf32>
    %197 = vector.shape_cast %196 : vector<8x8xf32> to vector<1x8x8xf32>
    %cst_58 = arith.constant dense<0.000000e+00> : vector<1xf32>
    %198 = vector.multi_reduction <add>, %197, %cst_58 [1, 2] : vector<1x8x8xf32> to vector<1xf32>
    %199 = vector.shape_cast %198 : vector<1xf32> to vector<1x1x1xf32>
    %200 = vector.extract %199[0, 0, 0] : f32 from vector<1x1x1xf32>
    %c1_59 = arith.constant 1 : index
    %c0_60 = arith.constant 0 : index
    %201 = memref.load %arg4[%c1_59, %c0_60] : memref<3x5xf32, #tpu.memory_space<smem>>
    memref.store %200, %arg4[%c1_59, %c0_60] : memref<3x5xf32, #tpu.memory_space<smem>>
    %c1_61 = arith.constant 1 : index
    %202 = memref.load %arg0[%c1_61] : memref<5xi32, #tpu.memory_space<smem>>
    %c1_62 = arith.constant 1 : index
    %203 = memref.load %arg0[%c1_62] : memref<5xi32, #tpu.memory_space<smem>>
    %204 = arith.muli %202, %203 : i32
    %205 = arith.sitofp %204 : i32 to f32
    %206 = vector.broadcast %205 : f32 to vector<8x8xf32>
    %207 = arith.cmpf olt, %188, %206 : vector<8x8xf32>
    %208 = arith.extui %207 : vector<8x8xi1> to vector<8x8xi32>
    %209 = arith.sitofp %208 : vector<8x8xi32> to vector<8x8xf32>
    %210 = vector.shape_cast %209 : vector<8x8xf32> to vector<1x8x8xf32>
    %cst_63 = arith.constant dense<0.000000e+00> : vector<1xf32>
    %211 = vector.multi_reduction <add>, %210, %cst_63 [1, 2] : vector<1x8x8xf32> to vector<1xf32>
    %212 = vector.shape_cast %211 : vector<1xf32> to vector<1x1x1xf32>
    %213 = vector.extract %212[0, 0, 0] : f32 from vector<1x1x1xf32>
    %c1_64 = arith.constant 1 : index
    %c1_65 = arith.constant 1 : index
    %214 = memref.load %arg4[%c1_64, %c1_65] : memref<3x5xf32, #tpu.memory_space<smem>>
    memref.store %213, %arg4[%c1_64, %c1_65] : memref<3x5xf32, #tpu.memory_space<smem>>
    %c2_66 = arith.constant 2 : index
    %215 = memref.load %arg0[%c2_66] : memref<5xi32, #tpu.memory_space<smem>>
    %c2_67 = arith.constant 2 : index
    %216 = memref.load %arg0[%c2_67] : memref<5xi32, #tpu.memory_space<smem>>
    %217 = arith.muli %215, %216 : i32
    %218 = arith.sitofp %217 : i32 to f32
    %219 = vector.broadcast %218 : f32 to vector<8x8xf32>
    %220 = arith.cmpf olt, %188, %219 : vector<8x8xf32>
    %221 = arith.extui %220 : vector<8x8xi1> to vector<8x8xi32>
    %222 = arith.sitofp %221 : vector<8x8xi32> to vector<8x8xf32>
    %223 = vector.shape_cast %222 : vector<8x8xf32> to vector<1x8x8xf32>
    %cst_68 = arith.constant dense<0.000000e+00> : vector<1xf32>
    %224 = vector.multi_reduction <add>, %223, %cst_68 [1, 2] : vector<1x8x8xf32> to vector<1xf32>
    %225 = vector.shape_cast %224 : vector<1xf32> to vector<1x1x1xf32>
    %226 = vector.extract %225[0, 0, 0] : f32 from vector<1x1x1xf32>
    %c1_69 = arith.constant 1 : index
    %c2_70 = arith.constant 2 : index
    %227 = memref.load %arg4[%c1_69, %c2_70] : memref<3x5xf32, #tpu.memory_space<smem>>
    memref.store %226, %arg4[%c1_69, %c2_70] : memref<3x5xf32, #tpu.memory_space<smem>>
    %c3_71 = arith.constant 3 : index
    %228 = memref.load %arg0[%c3_71] : memref<5xi32, #tpu.memory_space<smem>>
    %c3_72 = arith.constant 3 : index
    %229 = memref.load %arg0[%c3_72] : memref<5xi32, #tpu.memory_space<smem>>
    %230 = arith.muli %228, %229 : i32
    %231 = arith.sitofp %230 : i32 to f32
    %232 = vector.broadcast %231 : f32 to vector<8x8xf32>
    %233 = arith.cmpf olt, %188, %232 : vector<8x8xf32>
    %234 = arith.extui %233 : vector<8x8xi1> to vector<8x8xi32>
    %235 = arith.sitofp %234 : vector<8x8xi32> to vector<8x8xf32>
    %236 = vector.shape_cast %235 : vector<8x8xf32> to vector<1x8x8xf32>
    %cst_73 = arith.constant dense<0.000000e+00> : vector<1xf32>
    %237 = vector.multi_reduction <add>, %236, %cst_73 [1, 2] : vector<1x8x8xf32> to vector<1xf32>
    %238 = vector.shape_cast %237 : vector<1xf32> to vector<1x1x1xf32>
    %239 = vector.extract %238[0, 0, 0] : f32 from vector<1x1x1xf32>
    %c1_74 = arith.constant 1 : index
    %c3_75 = arith.constant 3 : index
    %240 = memref.load %arg4[%c1_74, %c3_75] : memref<3x5xf32, #tpu.memory_space<smem>>
    memref.store %239, %arg4[%c1_74, %c3_75] : memref<3x5xf32, #tpu.memory_space<smem>>
    %c4_76 = arith.constant 4 : index
    %241 = memref.load %arg0[%c4_76] : memref<5xi32, #tpu.memory_space<smem>>
    %c4_77 = arith.constant 4 : index
    %242 = memref.load %arg0[%c4_77] : memref<5xi32, #tpu.memory_space<smem>>
    %243 = arith.muli %241, %242 : i32
    %244 = arith.sitofp %243 : i32 to f32
    %245 = vector.broadcast %244 : f32 to vector<8x8xf32>
    %246 = arith.cmpf olt, %188, %245 : vector<8x8xf32>
    %247 = arith.extui %246 : vector<8x8xi1> to vector<8x8xi32>
    %248 = arith.sitofp %247 : vector<8x8xi32> to vector<8x8xf32>
    %249 = vector.shape_cast %248 : vector<8x8xf32> to vector<1x8x8xf32>
    %cst_78 = arith.constant dense<0.000000e+00> : vector<1xf32>
    %250 = vector.multi_reduction <add>, %249, %cst_78 [1, 2] : vector<1x8x8xf32> to vector<1xf32>
    %251 = vector.shape_cast %250 : vector<1xf32> to vector<1x1x1xf32>
    %252 = vector.extract %251[0, 0, 0] : f32 from vector<1x1x1xf32>
    %c1_79 = arith.constant 1 : index
    %c4_80 = arith.constant 4 : index
    %253 = memref.load %arg4[%c1_79, %c4_80] : memref<3x5xf32, #tpu.memory_space<smem>>
    memref.store %252, %arg4[%c1_79, %c4_80] : memref<3x5xf32, #tpu.memory_space<smem>>
    %254 = vector.shape_cast %0 : vector<8x64xf32> to vector<1x8x64xf32>
    %cst_81 = arith.constant dense<0x7F800000> : vector<1xf32>
    %255 = vector.multi_reduction <minimumf>, %254, %cst_81 [1, 2] : vector<1x8x64xf32> to vector<1xf32>
    %256 = vector.shape_cast %255 : vector<1xf32> to vector<1x1x1xf32>
    %257 = vector.extract %256[0, 0, 0] : f32 from vector<1x1x1xf32>
    %258 = vector.shape_cast %0 : vector<8x64xf32> to vector<1x8x64xf32>
    %cst_82 = arith.constant dense<0xFF800000> : vector<1xf32>
    %259 = vector.multi_reduction <maximumf>, %258, %cst_82 [1, 2] : vector<1x8x64xf32> to vector<1xf32>
    %260 = vector.shape_cast %259 : vector<1xf32> to vector<1x1x1xf32>
    %261 = vector.extract %260[0, 0, 0] : f32 from vector<1x1x1xf32>
    %262 = arith.subf %261, %257 : f32
    %cst_83 = arith.constant 0.000000e+00 : f32
    %263 = arith.cmpf ogt, %262, %cst_83 : f32
    %cst_84 = arith.constant 1.000000e+00 : f32
    %264 = arith.subf %257, %cst_84 : f32
    %265 = arith.select %263, %257, %264 : f32
    %cst_85 = arith.constant 0.000000e+00 : f32
    %266 = arith.cmpf ogt, %262, %cst_85 : f32
    %cst_86 = arith.constant 2.000000e+00 : f32
    %267 = arith.select %266, %262, %cst_86 : f32
    %cst_87 = arith.constant 1.000000e+00 : f32
    %268 = arith.divf %cst_87, %267 : f32
    %269 = vector.broadcast %265 : f32 to vector<8x64xf32>
    %270 = arith.subf %0, %269 : vector<8x64xf32>
    %271 = vector.broadcast %268 : f32 to vector<8x64xf32>
    %272 = arith.mulf %270, %271 : vector<8x64xf32>
    %cst_88 = arith.constant 5.120000e+02 : f32
    %273 = math.log %cst_88 : f32
    %c0_89 = arith.constant 0 : index
    %274 = memref.load %arg0[%c0_89] : memref<5xi32, #tpu.memory_space<smem>>
    %275 = arith.sitofp %274 : i32 to f32
    %276 = vector.broadcast %275 : f32 to vector<8x64xf32>
    %277 = arith.mulf %272, %276 : vector<8x64xf32>
    %278 = math.floor %277 : vector<8x64xf32>
    %cst_90 = arith.constant 1.000000e+00 : f32
    %279 = arith.subf %275, %cst_90 : f32
    %cst_91 = arith.constant 0.000000e+00 : f32
    %280 = vector.broadcast %cst_91 : f32 to vector<8x64xf32>
    %281 = arith.maximumf %280, %278 : vector<8x64xf32>
    %282 = vector.broadcast %279 : f32 to vector<8x64xf32>
    %283 = arith.minimumf %282, %281 : vector<8x64xf32>
    %cst_92 = arith.constant 0.000000e+00 : f32
    %c0_i32 = arith.constant 0 : i32
    %c16_i32 = arith.constant 16 : i32
    %284 = arith.addi %c0_i32, %c16_i32 : i32
    %c1_i32 = arith.constant 1 : i32
    %285 = scf.for %arg5 = %c0_i32 to %284 step %c1_i32 iter_args(%arg6 = %cst_92) -> (f32)  : i32 {
      %349 = arith.sitofp %arg5 : i32 to f32
      %350 = vector.broadcast %349 : f32 to vector<8x64xf32>
      %351 = arith.cmpf oeq, %283, %350 : vector<8x64xf32>
      %352 = arith.extui %351 : vector<8x64xi1> to vector<8x64xi32>
      %353 = arith.sitofp %352 : vector<8x64xi32> to vector<8x64xf32>
      %354 = vector.shape_cast %353 : vector<8x64xf32> to vector<1x8x64xf32>
      %cst_141 = arith.constant dense<0.000000e+00> : vector<1xf32>
      %355 = vector.multi_reduction <add>, %354, %cst_141 [1, 2] : vector<1x8x64xf32> to vector<1xf32>
      %356 = vector.shape_cast %355 : vector<1xf32> to vector<1x1x1xf32>
      %357 = vector.extract %356[0, 0, 0] : f32 from vector<1x1x1xf32>
      %cst_142 = arith.constant 0.000000e+00 : f32
      %358 = arith.cmpf ogt, %357, %cst_142 : f32
      %cst_143 = arith.constant 1.000000e+00 : f32
      %359 = arith.maximumf %357, %cst_143 : f32
      %360 = math.log %359 : f32
      %361 = arith.mulf %357, %360 : f32
      %cst_144 = arith.constant 0.000000e+00 : f32
      %362 = arith.select %358, %361, %cst_144 : f32
      %363 = arith.addf %arg6, %362 : f32
      scf.yield %363 : f32
    }
    %c16_i32_93 = arith.constant 16 : i32
    %cst_94 = arith.constant 0.001953125 : f32
    %286 = arith.mulf %285, %cst_94 : f32
    %287 = arith.subf %273, %286 : f32
    %c2_95 = arith.constant 2 : index
    %c0_96 = arith.constant 0 : index
    %288 = memref.load %arg4[%c2_95, %c0_96] : memref<3x5xf32, #tpu.memory_space<smem>>
    memref.store %287, %arg4[%c2_95, %c0_96] : memref<3x5xf32, #tpu.memory_space<smem>>
    %c1_97 = arith.constant 1 : index
    %289 = memref.load %arg0[%c1_97] : memref<5xi32, #tpu.memory_space<smem>>
    %290 = arith.sitofp %289 : i32 to f32
    %291 = vector.broadcast %290 : f32 to vector<8x64xf32>
    %292 = arith.mulf %272, %291 : vector<8x64xf32>
    %293 = math.floor %292 : vector<8x64xf32>
    %cst_98 = arith.constant 1.000000e+00 : f32
    %294 = arith.subf %290, %cst_98 : f32
    %cst_99 = arith.constant 0.000000e+00 : f32
    %295 = vector.broadcast %cst_99 : f32 to vector<8x64xf32>
    %296 = arith.maximumf %295, %293 : vector<8x64xf32>
    %297 = vector.broadcast %294 : f32 to vector<8x64xf32>
    %298 = arith.minimumf %297, %296 : vector<8x64xf32>
    %cst_100 = arith.constant 0.000000e+00 : f32
    %c0_i32_101 = arith.constant 0 : i32
    %c16_i32_102 = arith.constant 16 : i32
    %299 = arith.addi %c0_i32_101, %c16_i32_102 : i32
    %c1_i32_103 = arith.constant 1 : i32
    %300 = scf.for %arg5 = %c0_i32_101 to %299 step %c1_i32_103 iter_args(%arg6 = %cst_100) -> (f32)  : i32 {
      %349 = arith.sitofp %arg5 : i32 to f32
      %350 = vector.broadcast %349 : f32 to vector<8x64xf32>
      %351 = arith.cmpf oeq, %298, %350 : vector<8x64xf32>
      %352 = arith.extui %351 : vector<8x64xi1> to vector<8x64xi32>
      %353 = arith.sitofp %352 : vector<8x64xi32> to vector<8x64xf32>
      %354 = vector.shape_cast %353 : vector<8x64xf32> to vector<1x8x64xf32>
      %cst_141 = arith.constant dense<0.000000e+00> : vector<1xf32>
      %355 = vector.multi_reduction <add>, %354, %cst_141 [1, 2] : vector<1x8x64xf32> to vector<1xf32>
      %356 = vector.shape_cast %355 : vector<1xf32> to vector<1x1x1xf32>
      %357 = vector.extract %356[0, 0, 0] : f32 from vector<1x1x1xf32>
      %cst_142 = arith.constant 0.000000e+00 : f32
      %358 = arith.cmpf ogt, %357, %cst_142 : f32
      %cst_143 = arith.constant 1.000000e+00 : f32
      %359 = arith.maximumf %357, %cst_143 : f32
      %360 = math.log %359 : f32
      %361 = arith.mulf %357, %360 : f32
      %cst_144 = arith.constant 0.000000e+00 : f32
      %362 = arith.select %358, %361, %cst_144 : f32
      %363 = arith.addf %arg6, %362 : f32
      scf.yield %363 : f32
    }
    %c16_i32_104 = arith.constant 16 : i32
    %cst_105 = arith.constant 0.001953125 : f32
    %301 = arith.mulf %300, %cst_105 : f32
    %302 = arith.subf %273, %301 : f32
    %c2_106 = arith.constant 2 : index
    %c1_107 = arith.constant 1 : index
    %303 = memref.load %arg4[%c2_106, %c1_107] : memref<3x5xf32, #tpu.memory_space<smem>>
    memref.store %302, %arg4[%c2_106, %c1_107] : memref<3x5xf32, #tpu.memory_space<smem>>
    %c2_108 = arith.constant 2 : index
    %304 = memref.load %arg0[%c2_108] : memref<5xi32, #tpu.memory_space<smem>>
    %305 = arith.sitofp %304 : i32 to f32
    %306 = vector.broadcast %305 : f32 to vector<8x64xf32>
    %307 = arith.mulf %272, %306 : vector<8x64xf32>
    %308 = math.floor %307 : vector<8x64xf32>
    %cst_109 = arith.constant 1.000000e+00 : f32
    %309 = arith.subf %305, %cst_109 : f32
    %cst_110 = arith.constant 0.000000e+00 : f32
    %310 = vector.broadcast %cst_110 : f32 to vector<8x64xf32>
    %311 = arith.maximumf %310, %308 : vector<8x64xf32>
    %312 = vector.broadcast %309 : f32 to vector<8x64xf32>
    %313 = arith.minimumf %312, %311 : vector<8x64xf32>
    %cst_111 = arith.constant 0.000000e+00 : f32
    %c0_i32_112 = arith.constant 0 : i32
    %c16_i32_113 = arith.constant 16 : i32
    %314 = arith.addi %c0_i32_112, %c16_i32_113 : i32
    %c1_i32_114 = arith.constant 1 : i32
    %315 = scf.for %arg5 = %c0_i32_112 to %314 step %c1_i32_114 iter_args(%arg6 = %cst_111) -> (f32)  : i32 {
      %349 = arith.sitofp %arg5 : i32 to f32
      %350 = vector.broadcast %349 : f32 to vector<8x64xf32>
      %351 = arith.cmpf oeq, %313, %350 : vector<8x64xf32>
      %352 = arith.extui %351 : vector<8x64xi1> to vector<8x64xi32>
      %353 = arith.sitofp %352 : vector<8x64xi32> to vector<8x64xf32>
      %354 = vector.shape_cast %353 : vector<8x64xf32> to vector<1x8x64xf32>
      %cst_141 = arith.constant dense<0.000000e+00> : vector<1xf32>
      %355 = vector.multi_reduction <add>, %354, %cst_141 [1, 2] : vector<1x8x64xf32> to vector<1xf32>
      %356 = vector.shape_cast %355 : vector<1xf32> to vector<1x1x1xf32>
      %357 = vector.extract %356[0, 0, 0] : f32 from vector<1x1x1xf32>
      %cst_142 = arith.constant 0.000000e+00 : f32
      %358 = arith.cmpf ogt, %357, %cst_142 : f32
      %cst_143 = arith.constant 1.000000e+00 : f32
      %359 = arith.maximumf %357, %cst_143 : f32
      %360 = math.log %359 : f32
      %361 = arith.mulf %357, %360 : f32
      %cst_144 = arith.constant 0.000000e+00 : f32
      %362 = arith.select %358, %361, %cst_144 : f32
      %363 = arith.addf %arg6, %362 : f32
      scf.yield %363 : f32
    }
    %c16_i32_115 = arith.constant 16 : i32
    %cst_116 = arith.constant 0.001953125 : f32
    %316 = arith.mulf %315, %cst_116 : f32
    %317 = arith.subf %273, %316 : f32
    %c2_117 = arith.constant 2 : index
    %c2_118 = arith.constant 2 : index
    %318 = memref.load %arg4[%c2_117, %c2_118] : memref<3x5xf32, #tpu.memory_space<smem>>
    memref.store %317, %arg4[%c2_117, %c2_118] : memref<3x5xf32, #tpu.memory_space<smem>>
    %c3_119 = arith.constant 3 : index
    %319 = memref.load %arg0[%c3_119] : memref<5xi32, #tpu.memory_space<smem>>
    %320 = arith.sitofp %319 : i32 to f32
    %321 = vector.broadcast %320 : f32 to vector<8x64xf32>
    %322 = arith.mulf %272, %321 : vector<8x64xf32>
    %323 = math.floor %322 : vector<8x64xf32>
    %cst_120 = arith.constant 1.000000e+00 : f32
    %324 = arith.subf %320, %cst_120 : f32
    %cst_121 = arith.constant 0.000000e+00 : f32
    %325 = vector.broadcast %cst_121 : f32 to vector<8x64xf32>
    %326 = arith.maximumf %325, %323 : vector<8x64xf32>
    %327 = vector.broadcast %324 : f32 to vector<8x64xf32>
    %328 = arith.minimumf %327, %326 : vector<8x64xf32>
    %cst_122 = arith.constant 0.000000e+00 : f32
    %c0_i32_123 = arith.constant 0 : i32
    %c16_i32_124 = arith.constant 16 : i32
    %329 = arith.addi %c0_i32_123, %c16_i32_124 : i32
    %c1_i32_125 = arith.constant 1 : i32
    %330 = scf.for %arg5 = %c0_i32_123 to %329 step %c1_i32_125 iter_args(%arg6 = %cst_122) -> (f32)  : i32 {
      %349 = arith.sitofp %arg5 : i32 to f32
      %350 = vector.broadcast %349 : f32 to vector<8x64xf32>
      %351 = arith.cmpf oeq, %328, %350 : vector<8x64xf32>
      %352 = arith.extui %351 : vector<8x64xi1> to vector<8x64xi32>
      %353 = arith.sitofp %352 : vector<8x64xi32> to vector<8x64xf32>
      %354 = vector.shape_cast %353 : vector<8x64xf32> to vector<1x8x64xf32>
      %cst_141 = arith.constant dense<0.000000e+00> : vector<1xf32>
      %355 = vector.multi_reduction <add>, %354, %cst_141 [1, 2] : vector<1x8x64xf32> to vector<1xf32>
      %356 = vector.shape_cast %355 : vector<1xf32> to vector<1x1x1xf32>
      %357 = vector.extract %356[0, 0, 0] : f32 from vector<1x1x1xf32>
      %cst_142 = arith.constant 0.000000e+00 : f32
      %358 = arith.cmpf ogt, %357, %cst_142 : f32
      %cst_143 = arith.constant 1.000000e+00 : f32
      %359 = arith.maximumf %357, %cst_143 : f32
      %360 = math.log %359 : f32
      %361 = arith.mulf %357, %360 : f32
      %cst_144 = arith.constant 0.000000e+00 : f32
      %362 = arith.select %358, %361, %cst_144 : f32
      %363 = arith.addf %arg6, %362 : f32
      scf.yield %363 : f32
    }
    %c16_i32_126 = arith.constant 16 : i32
    %cst_127 = arith.constant 0.001953125 : f32
    %331 = arith.mulf %330, %cst_127 : f32
    %332 = arith.subf %273, %331 : f32
    %c2_128 = arith.constant 2 : index
    %c3_129 = arith.constant 3 : index
    %333 = memref.load %arg4[%c2_128, %c3_129] : memref<3x5xf32, #tpu.memory_space<smem>>
    memref.store %332, %arg4[%c2_128, %c3_129] : memref<3x5xf32, #tpu.memory_space<smem>>
    %c4_130 = arith.constant 4 : index
    %334 = memref.load %arg0[%c4_130] : memref<5xi32, #tpu.memory_space<smem>>
    %335 = arith.sitofp %334 : i32 to f32
    %336 = vector.broadcast %335 : f32 to vector<8x64xf32>
    %337 = arith.mulf %272, %336 : vector<8x64xf32>
    %338 = math.floor %337 : vector<8x64xf32>
    %cst_131 = arith.constant 1.000000e+00 : f32
    %339 = arith.subf %335, %cst_131 : f32
    %cst_132 = arith.constant 0.000000e+00 : f32
    %340 = vector.broadcast %cst_132 : f32 to vector<8x64xf32>
    %341 = arith.maximumf %340, %338 : vector<8x64xf32>
    %342 = vector.broadcast %339 : f32 to vector<8x64xf32>
    %343 = arith.minimumf %342, %341 : vector<8x64xf32>
    %cst_133 = arith.constant 0.000000e+00 : f32
    %c0_i32_134 = arith.constant 0 : i32
    %c16_i32_135 = arith.constant 16 : i32
    %344 = arith.addi %c0_i32_134, %c16_i32_135 : i32
    %c1_i32_136 = arith.constant 1 : i32
    %345 = scf.for %arg5 = %c0_i32_134 to %344 step %c1_i32_136 iter_args(%arg6 = %cst_133) -> (f32)  : i32 {
      %349 = arith.sitofp %arg5 : i32 to f32
      %350 = vector.broadcast %349 : f32 to vector<8x64xf32>
      %351 = arith.cmpf oeq, %343, %350 : vector<8x64xf32>
      %352 = arith.extui %351 : vector<8x64xi1> to vector<8x64xi32>
      %353 = arith.sitofp %352 : vector<8x64xi32> to vector<8x64xf32>
      %354 = vector.shape_cast %353 : vector<8x64xf32> to vector<1x8x64xf32>
      %cst_141 = arith.constant dense<0.000000e+00> : vector<1xf32>
      %355 = vector.multi_reduction <add>, %354, %cst_141 [1, 2] : vector<1x8x64xf32> to vector<1xf32>
      %356 = vector.shape_cast %355 : vector<1xf32> to vector<1x1x1xf32>
      %357 = vector.extract %356[0, 0, 0] : f32 from vector<1x1x1xf32>
      %cst_142 = arith.constant 0.000000e+00 : f32
      %358 = arith.cmpf ogt, %357, %cst_142 : f32
      %cst_143 = arith.constant 1.000000e+00 : f32
      %359 = arith.maximumf %357, %cst_143 : f32
      %360 = math.log %359 : f32
      %361 = arith.mulf %357, %360 : f32
      %cst_144 = arith.constant 0.000000e+00 : f32
      %362 = arith.select %358, %361, %cst_144 : f32
      %363 = arith.addf %arg6, %362 : f32
      scf.yield %363 : f32
    }
    %c16_i32_137 = arith.constant 16 : i32
    %cst_138 = arith.constant 0.001953125 : f32
    %346 = arith.mulf %345, %cst_138 : f32
    %347 = arith.subf %273, %346 : f32
    %c2_139 = arith.constant 2 : index
    %c4_140 = arith.constant 4 : index
    %348 = memref.load %arg4[%c2_139, %c4_140] : memref<3x5xf32, #tpu.memory_space<smem>>
    memref.store %347, %arg4[%c2_139, %c4_140] : memref<3x5xf32, #tpu.memory_space<smem>>
    return
  }
}

</mosaic_0001>

<bundles_post_ra>
// kernel: run.1
= control target key start
LH: loop header
LB: loop body
LE: loop exit
PB: predicated region body
PF: predicated region fallthrough
CT: control target
= control target key end

     0   :  { %9 = vsyncpa [#allocation4], 0  ;;  %s2090_s0 = inlined_call_operand.hbm [shape: s32[5], index: 0, kind: input, shape index: {}]   ;;  %s2091_s1 = inlined_call_operand.vmem [shape: s32[15], index: 1, kind: input, shape index: {}]   ;;  %s2092_s2 = inlined_call_operand.hbm [shape: f32[8,64], index: 2, kind: input, shape index: {}]   ;;  %s2093_s3 = inlined_call_operand.hbm [shape: f32[15,64,128], index: 3, kind: input, shape index: {}]   ;;  %s2094_s4 = inlined_call_operand.hbm [shape: f32[3,5], index: 4, kind: output, shape index: {}]  }
   0x1   :  { %10 = vsyncpa [#allocation6], 0 }
   0x2   :  { %11 = vsyncpa [#allocation3], 0 }
   0x3   :  { %12 = vsyncpa [#allocation10], 0 }
   0x4   :  { %13 = vsyncpa [#allocation5], 0  ;;  %s28_s17 = sshll.u32 %s2091_s1, 4  ;;  %s1751_s18 = smov [#allocation2]   ;;  %s29_s17 = int_to_ptr.vmem [resolvable:$true] %s28_s17 }
   0x5   :  { %21 = dma.hbm_to_smem %s2090_s0, 16, %s1751_s18, [#allocation4]  }
   0x6   :  { %s1601_s21 = scalar_lea.vmem %s29_s17, 16  ;;  %p1606_p1 = scmp.lt.s32.totalorder %s29_s17, %s29_s17 }
   0x7   :  { %p1602_p0 = scmp.ne.s32.totalorder %s29_s17, %s1601_s21  ;;  %p1607_p2 = scmp.lt.s32.totalorder %s1601_s21, %s1601_s21 }
   0x9   :  { %p1608_p3 = por %p1607_p2, %p1606_p1 }
   0xb   :  { %p1609_p4 = pnand %p1608_p3, %p1602_p0 }
   0xd   :  { %1612 = shalt.err (!%p1609_p4)
}
   0xe   :  { %s1752_s22 = smov [#allocation7]   ;;  %s1753_s23 = smov [#allocation8]  }
   0xf   :  { %31 = dma.vmem_to_smem %s29_s17, 16, %s1752_s22, [#allocation6]  }
  0x10   :  { %s38_s24 = sshll.u32 %s1753_s23, 4  ;;  %s1754_s25 = smov [#allocation9]   ;;  %s39_s24 = int_to_ptr.vmem [resolvable:$true] %s38_s24 }
  0x11   :  { %s47_s26 = sshll.u32 %s1754_s25, 4  ;;  %s1621_s1 = scalar_lea.vmem %s39_s24, 128  ;;  %s48_s26 = int_to_ptr.vmem [resolvable:$true] %s47_s26 }
  0x12   :  { %p1622_p5 = scmp.ne.s32.totalorder %s39_s24, %s1621_s1  ;;  %p1626_p6 = scmp.lt.s32.totalorder %s39_s24, %s39_s24 }
  0x13   :  { %p1627_p7 = scmp.lt.s32.totalorder %s1621_s1, %s1621_s1 }
  0x15   :  { %p1628_p8 = por %p1627_p7, %p1626_p6 }
  0x17   :  { %p1629_p9 = pnand %p1628_p8, %p1622_p5 }
  0x19   :  { %1632 = shalt.err (!%p1629_p9)
}
  0x1a   :  { %41 = dma.hbm_to_vmem [thread:$0]  %s2092_s2, 128, %s39_s24, [#allocation3]  }
  0x1b   :  { %s1641_s28 = scalar_lea.vmem %s48_s26, 15360  ;;  %p1646_p11 = scmp.lt.s32.totalorder %s48_s26, %s48_s26 }
  0x1c   :  { %p1642_p10 = scmp.ne.s32.totalorder %s48_s26, %s1641_s28  ;;  %p1647_p12 = scmp.lt.s32.totalorder %s1641_s28, %s1641_s28 }
  0x1e   :  { %p1648_p13 = por %p1647_p12, %p1646_p11 }
  0x20   :  { %p1649_p0 = pnand %p1648_p13, %p1642_p10 }
  0x22   :  { %1652 = shalt.err (!%p1649_p0)
}
  0x23   :  { %s1755_s29 = smov 128   ;;  %s1756_s30 = smov 8  }
  0x24   :  { %53 = dma.hbm_to_vmem [thread:$0]  %s2093_s3, 15360, %s48_s26, [#allocation10], %s1755_s29, %s1755_s29, %s1756_s30  }
  0x25   :  { %1701 = dma.done.wait [#allocation4], 16  }
  0x26   :  { %1702 = vsyncadd [#allocation4], 4294967280 }
  0x27   :  { %1703 = dma.done.wait [#allocation6], 16  }
  0x28   :  { %1704 = vsyncadd [#allocation6], 4294967280 }
  0x29   :  { %1705 = dma.done.wait [#allocation3], 128  }
  0x2a   :  { %1706 = vsyncadd [#allocation3], 4294967168 }
  0x2b   :  { %1707 = dma.done.wait [#allocation10], 15360  }
  0x2c   :  { %1708 = vsyncadd [#allocation10], 4294951936 }
  0x2d   :  { %66 = sfence }
  0x2e   :  { %s1807_s2 = sld [smem:[#allocation2]]  ;;  %v1809_v0 = vld [vmem:[#allocation8] sm:$0xff]  ;;  %vm68_vm0 = vcmask 523264   ;;  %v1757_v1 = vmov 0.0   ;;  %vm1758_vm1 = vmmov 0   ;;  %v76_v7 = vlaneseq }
  0x2f   :  { %1305 = vmatprep.subr.mxu0 %v1757_v1  ;;  %v69_v2 = vsel %vm68_vm0, %v1809_v0, 0.0  ;;  %1324 = vmatprep.subr.mxu1 %v1757_v1  ;;  %vm87_vm2 = vcmask 516096   ;;  %s1844_s11 = sld [smem:[#allocation2 + $0x1]] }
  0x30   :  { %v70_v3 = vrot.slane %v69_v2, 4  ;;  %1321 = vmatprep.mubr.msk.f32.mxu0 %vm1758_vm1, %v1757_v1  ;;  %1340 = vmatprep.mubr.msk.f32.mxu1 %vm1758_vm1, %v1757_v1  ;;  %v1824_v12 = vand.u32 127, %v76_v7  ;;  %s1871_s24 = sld [smem:[#allocation2 + $0x2]] }
  0x32   :  { %v71_v4 = vadd.f32 %v70_v3, %v69_v2 }
  0x34   :  { %s1208_s3 = sadd.s32 4294967294, %s1807_s2  ;;  %v72_v5 = vrot.slane %v71_v4, 2  ;;  %s81_s18 = scvt.s32.f32 %s1807_s2 }
  0x35   :  { %s1209_s7 = sshll.u32 %s1208_s3, 6  ;;  %s1820_s8 = sld [smem:[#allocation7 + %s1208_s3]] }
  0x36   :  { %v73_v6 = vadd.f32 %v72_v5, %v71_v4  ;;  %s105_s9 = scalar_lea.vmem [#allocation9], %s1209_s7  ;;  %s1213_s12 = sadd.s32 4294967294, %s1844_s11 }
  0x37   :  { %v113_v8 = vld [vmem:[%s105_s9 + $0x38] sm:$0xff]  ;;  %v112_v9 = vld [vmem:[%s105_s9 + $0x30] sm:$0xff]  ;;  %v111_v11 = vld [vmem:[%s105_s9 + $0x28] sm:$0xff]  ;;  %s1847_s13 = sld [smem:[#allocation7 + %s1213_s12]]  ;;  %s1214_s15 = sshll.u32 %s1213_s12, 6 }
  0x38   :  { %1306 = vmatpush3.msra.mxu0 %v113_v8  ;;  %v74_v10 = vrot.slane %v73_v6, 1  ;;  %v110_v13 = vld [vmem:[%s105_s9 + $0x20] sm:$0xff]  ;;  %v109_v16 = vld [vmem:[%s105_s9 + $0x18] sm:$0xff]  ;;  %v108_v18 = vld [vmem:[%s105_s9 + $0x10] sm:$0xff]  ;;  %s231_s16 = scalar_lea.vmem [#allocation9], %s1214_s15  ;;  %s1218_s25 = sadd.s32 4294967294, %s1871_s24 }
  0x39   :  { %1307 = vmatprep.subr.mxu0 %v1757_v1  ;;  %v107_v20 = vld [vmem:[%s105_s9 + $0x8] sm:$0xff]  ;;  %v106_v21 = vld [vmem:[%s105_s9] sm:$0xff]  ;;  %v239_v23 = vld [vmem:[%s231_s16 + $0x38] sm:$0xff]  ;;  %s1874_s26 = sld [smem:[#allocation7 + %s1218_s25]]  ;;  %s1219_s0 = sshll.u32 %s1218_s25, 6 }
  0x3a   :  { %1308 = vmatpush3.msra.mxu0 %v112_v9  ;;  %v1827_v14 = vadd.f32 %v74_v10, %v73_v6  ;;  %1325 = vmatpush3.msra.mxu1 %v239_v23  ;;  %v238_v26 = vld [vmem:[%s231_s16 + $0x30] sm:$0xff]  ;;  %v237_v27 = vld [vmem:[%s231_s16 + $0x28] sm:$0xff]  ;;  %v236_v28 = vld [vmem:[%s231_s16 + $0x20] sm:$0xff]  ;;  %s354_s27 = scalar_lea.vmem [#allocation9], %s1219_s0  ;;  %s208_s29 = scvt.s32.f32 %s1844_s11 }
  0x3b   :  { %1309 = vmatprep.subr.mxu0 %v1757_v1  ;;  %s83_s10 = smul.u32 %s1820_s8, %s1807_s2  ;;  %1326 = vmatprep.subr.mxu1 %v1757_v1  ;;  %v235_v29 = vld [vmem:[%s231_s16 + $0x18] sm:$0xff]  ;;  %v234_v30 = vld [vmem:[%s231_s16 + $0x10] sm:$0xff]  ;;  %v233_v31 = vld [vmem:[%s231_s16 + $0x8] sm:$0xff]  ;;  %s82_s17 = scvt.s32.f32 %s1820_s8  ;;  %v189_v43 = vstv %s1820_s8 }
  0x3c   :  { %1310 = vmatpush3.msra.mxu0 %v111_v11  ;;  %1327 = vmatpush3.msra.mxu1 %v238_v26  ;;  %v232_v32 = vld [vmem:[%s231_s16] sm:$0xff]  ;;  %vm190_vm5 = vcmp.lt.s32.totalorder %v1824_v12, %v189_v43  ;;  %v362_v48 = vld [vmem:[%s354_s27 + $0x38] sm:$0xff]  ;;  %v361_v52 = vld [vmem:[%s354_s27 + $0x30] sm:$0xff]  ;;  %s1898_s9 = sld [smem:[#allocation2 + $0x3]] }
  0x3d   :  { %1311 = vmatprep.subr.mxu0 %v1757_v1  ;;  %v84_v15 = vstv %s83_s10  ;;  %s210_s14 = smul.u32 %s1844_s11, %s1847_s13  ;;  %1328 = vmatprep.subr.mxu1 %v1757_v1  ;;  %v360_v54 = vld [vmem:[%s354_s27 + $0x28] sm:$0xff]  ;;  %v359_v55 = vld [vmem:[%s354_s27 + $0x20] sm:$0xff]  ;;  %v358_v56 = vld [vmem:[%s354_s27 + $0x18] sm:$0xff]  ;;  %s209_s28 = scvt.s32.f32 %s1847_s13 }
  0x3e   :  { %1312 = vmatpush3.msra.mxu0 %v110_v13  ;;  %vm85_vm3 = vcmp.lt.s32.totalorder %v1824_v12, %v84_v15  ;;  %1329 = vmatpush3.msra.mxu1 %v237_v27  ;;  %s98_s19 = smul.f32 8.0, %s82_s17  ;;  %v357_v57 = vld [vmem:[%s354_s27 + $0x10] sm:$0xff]  ;;  %v356_v58 = vld [vmem:[%s354_s27 + $0x8] sm:$0xff]  ;;  %v355_v59 = vld [vmem:[%s354_s27] sm:$0xff]  ;;  %s331_s17 = scvt.s32.f32 %s1871_s24 }
  0x3f   :  { %1313 = vmatprep.subr.mxu0 %v1757_v1  ;;  %v86_v17 = vsel %vm85_vm3, %v1827_v14, 0.0  ;;  %v211_v22 = vstv %s210_s14  ;;  %1330 = vmatprep.subr.mxu1 %v1757_v1  ;;  %s333_s1 = smul.u32 %s1871_s24, %s1874_s26  ;;  %s332_s16 = scvt.s32.f32 %s1874_s26 }
  0x40   :  { %v88_v19 = vsel %vm87_vm2, %v86_v17, 0.0  ;;  %1314 = vmatpush3.msra.mxu0 %v109_v16  ;;  %vm212_vm4 = vcmp.lt.s32.totalorder %v1824_v12, %v211_v22  ;;  %1331 = vmatpush3.msra.mxu1 %v236_v28  ;;  %s99_s20 = smul.f32 %s98_s19, %s81_s18  ;;  %v312_v17 = vstv %s1847_s13  ;;  %s1929_s25 = sld [smem:[#allocation2 + $0x4]] }
  0x41   :  { %89 = vadd.xlane.f32.xlu0 %v88_v19  ;;  %1315 = vmatprep.subr.mxu0 %v1757_v1  ;;  %v213_v24 = vsel %vm212_vm4, %v1827_v14, 0.0  ;;  %v334_v47 = vstv %s333_s1  ;;  %s224_s30 = smul.f32 8.0, %s209_s28  ;;  %vm313_vm9 = vcmp.lt.s32.totalorder %v1824_v12, %v312_v17 }
  0x42   :  { %1316 = vmatpush3.msra.mxu0 %v108_v18  ;;  %v214_v25 = vsel %vm87_vm2, %v213_v24, 0.0  ;;  %1332 = vmatprep.subr.mxu1 %v1757_v1  ;;  %v100_v33 = vstv %s99_s20  ;;  %vm335_vm8 = vcmp.lt.s32.totalorder %v1824_v12, %v334_v47  ;;  %s1223_s10 = sadd.s32 4294967294, %s1898_s9  ;;  %s347_s18 = smul.f32 8.0, %s332_s16 }
  0x43   :  { %1317 = vmatprep.subr.mxu0 %v1757_v1  ;;  %215 = vadd.xlane.f32.xlu1 %v214_v25  ;;  %1570 = vrcp.f32 %v100_v33  ;;  %v336_v49 = vsel %vm335_vm8, %v1827_v14, 0.0  ;;  %s225_s5 = smul.f32 %s224_s30, %s208_s29  ;;  %s1901_s12 = sld [smem:[#allocation7 + %s1223_s10]] }
  0x44   :  { %1318 = vmatpush3.msra.mxu0 %v107_v20  ;;  %1333 = vmatpush3.msra.mxu1 %v235_v29  ;;  %v337_v50 = vsel %vm87_vm2, %v336_v49, 0.0  ;;  %s1224_s13 = sshll.u32 %s1223_s10, 6  ;;  %s348_s19 = smul.f32 %s347_s18, %s331_s17  ;;  %v435_v49 = vstv %s1874_s26 }
  0x45   :  { %1319 = vmatprep.subr.mxu0 %v1757_v1  ;;  %1334 = vmatprep.subr.mxu1 %v1757_v1  ;;  %v226_v63 = vstv %s225_s5  ;;  %s477_s15 = scalar_lea.vmem [#allocation9], %s1224_s13  ;;  %vm436_vm13 = vcmp.lt.s32.totalorder %v1824_v12, %v435_v49  ;;  %s454_s30 = scvt.s32.f32 %s1898_s9 }
  0x46   :  { %1320 = vmatpush3.msra.mxu0 %v106_v21  ;;  %1335 = vmatpush3.msra.mxu1 %v234_v30  ;;  %1572 = vrcp.f32 %v226_v63  ;;  %v485_v21 = vld [vmem:[%s477_s15 + $0x38] sm:$0xff]  ;;  %v484_v25 = vld [vmem:[%s477_s15 + $0x30] sm:$0xff]  ;;  %v483_v27 = vld [vmem:[%s477_s15 + $0x28] sm:$0xff]  ;;  %s1228_s1 = sadd.s32 4294967294, %s1929_s25  ;;  %s794_s16 = smul.u32 %s1807_s2, %s1807_s2 }
  0x47   :  { %1322 = vmatmul.mubr.msk.f32.vlgmr.msra.gmra.mxu0 %vm68_vm0, %v1809_v0  ;;  %1343 = vmatprep.subr.mxu0 %v1757_v1  ;;  %v482_v28 = vld [vmem:[%s477_s15 + $0x20] sm:$0xff]  ;;  %v481_v29 = vld [vmem:[%s477_s15 + $0x18] sm:$0xff]  ;;  %v480_v30 = vld [vmem:[%s477_s15 + $0x10] sm:$0xff]  ;;  %s1932_s0 = sld [smem:[#allocation7 + %s1228_s1]]  ;;  %s1229_s26 = sshll.u32 %s1228_s1, 6 }
  0x48   :  { %1359 = vmatprep.mubr.msk.f32.mxu0 %vm1758_vm1, %v1757_v1  ;;  %1336 = vmatprep.subr.mxu1 %v1757_v1  ;;  %s600_s28 = scalar_lea.vmem [#allocation9], %s1229_s26  ;;  %s814_s17 = smul.u32 %s1844_s11, %s1844_s11 }
  0x49   :  { %1337 = vmatpush3.msra.mxu1 %v233_v31  ;;  %1344 = vmatpush3.msra.mxu0 %v362_v48  ;;  %s456_s14 = smul.u32 %s1898_s9, %s1901_s12  ;;  %v479_v31 = vld [vmem:[%s477_s15 + $0x8] sm:$0xff]  ;;  %v601_v63 = vld [vmem:[%s600_s28] sm:$0xff]  ;;  %s455_s29 = scvt.s32.f32 %s1901_s12 }
  0x4a   :  { %1338 = vmatprep.subr.mxu1 %v1757_v1  ;;  %1345 = vmatprep.subr.mxu0 %v1757_v1  ;;  %s833_s18 = smul.u32 %s1871_s24, %s1871_s24  ;;  %s795_s2 = scvt.s32.f32 %s794_s16 }
  0x4b   :  { %1339 = vmatpush3.msra.mxu1 %v232_v32  ;;  %1346 = vmatpush3.msra.mxu0 %v361_v52  ;;  %v457_v20 = vstv %s456_s14  ;;  %v478_v32 = vld [vmem:[%s477_s15] sm:$0xff]  ;;  %s470_s5 = smul.f32 8.0, %s455_s29  ;;  %s577_s14 = scvt.s32.f32 %s1929_s25 }
  0x4c   :  { %1341 = vmatmul.mubr.msk.f32.vlgmr.msra.gmra.mxu1 %vm68_vm0, %v1809_v0  ;;  %1362 = vmatprep.subr.mxu1 %v1757_v1  ;;  %vm458_vm12 = vcmp.lt.s32.totalorder %v1824_v12, %v457_v20  ;;  %v796_v49 = vstv %s795_s2 }
  0x4d   :  { %1378 = vmatprep.mubr.msk.f32.mxu1 %vm1758_vm1, %v1757_v1  ;;  %1347 = vmatprep.subr.mxu0 %v1757_v1  ;;  %v459_v22 = vsel %vm458_vm12, %v1827_v14, 0.0  ;;  %s579_s27 = smul.u32 %s1929_s25, %s1932_s0 }
  0x4e   :  { %1348 = vmatpush3.msra.mxu0 %v360_v54  ;;  %1363 = vmatpush3.msra.mxu1 %v485_v21  ;;  %v460_v23 = vsel %vm87_vm2, %v459_v22, 0.0  ;;  %v558_v21 = vstv %s1901_s12  ;;  %s578_s12 = scvt.s32.f32 %s1932_s0 }
  0x4f   :  { %1349 = vmatprep.subr.mxu0 %v1757_v1  ;;  %1364 = vmatprep.subr.mxu1 %v1757_v1  ;;  %v580_v52 = vstv %s579_s27 }
  0x50   :  { %v1571_v40 = vpop.eup %1570  ;;  %1350 = vmatpush3.msra.mxu0 %v359_v55  ;;  %1365 = vmatpush3.msra.mxu1 %v484_v25  ;;  %s593_s13 = smul.f32 8.0, %s578_s12 }
  0x51   :  { %1351 = vmatprep.subr.mxu0 %v1757_v1  ;;  %1366 = vmatprep.subr.mxu1 %v1757_v1 }
  0x52   :  { %1352 = vmatpush3.msra.mxu0 %v358_v56  ;;  %1367 = vmatpush3.msra.mxu1 %v483_v27  ;;  %s594_s15 = smul.f32 %s593_s13, %s577_s14  ;;  %s1993_s13 = smov 0.0  }
  0x53   :  { %1353 = vmatprep.subr.mxu0 %v1757_v1  ;;  %v1573_v15 = vpop.eup %1572  ;;  %1368 = vmatprep.subr.mxu1 %v1757_v1 }
  0x54   :  { %1354 = vmatpush3.msra.mxu0 %v357_v57  ;;  %1369 = vmatpush3.msra.mxu1 %v482_v28  ;;  %v607_v57 = vld [vmem:[%s600_s28 + $0x30] sm:$0xff] }
  0x55   :  { %1355 = vmatprep.subr.mxu0 %v1757_v1  ;;  %1370 = vmatprep.subr.mxu1 %v1757_v1 }
  0x56   :  { %1356 = vmatpush3.msra.mxu0 %v356_v58  ;;  %1371 = vmatpush3.msra.mxu1 %v481_v29 }
  0x57   :  { %1357 = vmatprep.subr.mxu0 %v1757_v1  ;;  %1372 = vmatprep.subr.mxu1 %v1757_v1 }
  0x58   :  { %1358 = vmatpush3.msra.mxu0 %v355_v59  ;;  %1373 = vmatpush3.msra.mxu1 %v480_v30  ;;  %v606_v59 = vld [vmem:[%s600_s28 + $0x28] sm:$0xff] }
  0x59   :  { %1360 = vmatmul.mubr.msk.f32.vlgmr.msra.gmra.mxu0 %vm68_vm0, %v1809_v0  ;;  %1381 = vmatprep.subr.mxu0 %v1757_v1 }
  0x5a   :  { %1397 = vmatprep.mubr.msk.f32.mxu0 %vm1758_vm1, %v1757_v1  ;;  %1374 = vmatprep.subr.mxu1 %v1757_v1 }
  0x5b   :  { %1375 = vmatpush3.msra.mxu1 %v479_v31 }
  0x5c   :  { %1376 = vmatprep.subr.mxu1 %v1757_v1 }
  0x5d   :  { %1377 = vmatpush3.msra.mxu1 %v478_v32 }
  0x5e   :  { %1379 = vmatmul.mubr.msk.f32.vlgmr.msra.gmra.mxu1 %vm68_vm0, %v1809_v0  ;;  %1400 = vmatprep.subr.mxu1 %v1757_v1 }
  0x5f   :  { %1401 = vmatpush3.xpose.msk.msra.mxu1 %vm68_vm0, %v1809_v0  ;;  %1402 = vmatprep.mubr.msk.f32.mxu1 %vm1758_vm1, %v1757_v1  ;;  %vm581_vm1 = vcmp.lt.s32.totalorder %v1824_v12, %v580_v52 }
  0x60   :  { %v582_v54 = vsel %vm581_vm1, %v1827_v14, 0.0  ;;  %v604_v14 = vld [vmem:[%s600_s28 + $0x18] sm:$0xff] }
  0x61   :  { %v583_v55 = vsel %vm87_vm2, %v582_v54, 0.0  ;;  %vm559_vm2 = vcmp.lt.s32.totalorder %v1824_v12, %v558_v21 }
  0x62   :  { %1403 = vmatmul.mubr.msk.f32.vlgmr.msra.gmra.mxu1 %vm68_vm0, %v1809_v0 }
  0xca   :  { %v90_v34 = vpop.xlane.xlu0 %89 }
  0xcb   :  { %v91_v35 = vrot.slane %v90_v34, 4 }
  0xcc   :  { %v216_v60 = vpop.xlane.xlu1 %215 }
  0xcd   :  { %v92_v36 = vadd.f32 %v91_v35, %v90_v34  ;;  %v217_v61 = vrot.slane %v216_v60, 4 }
  0xcf   :  { %v93_v37 = vrot.slane %v92_v36, 2  ;;  %v218_v62 = vadd.f32 %v217_v61, %v216_v60  ;;  %v605_v60 = vld [vmem:[%s600_s28 + $0x20] sm:$0xff]  ;;  %v603_v61 = vld [vmem:[%s600_s28 + $0x10] sm:$0xff] }
  0xd1   :  { %v94_v38 = vadd.f32 %v93_v37, %v92_v36  ;;  %v219_v2 = vrot.slane %v218_v62, 2  ;;  %v349_v36 = vstv %s348_s19  ;;  %s852_s19 = smul.u32 %s1898_s9, %s1898_s9 }
  0xd2   :  { %1574 = vrcp.f32 %v349_v36 }
  0xd3   :  { %v95_v39 = vrot.slane %v94_v38, 1  ;;  %v220_v6 = vadd.f32 %v219_v2, %v218_v62  ;;  %v602_v62 = vld [vmem:[%s600_s28 + $0x8] sm:$0xff] }
  0xd5   :  { %v96_v41 = vadd.f32 %v95_v39, %v94_v38  ;;  %v221_v10 = vrot.slane %v220_v6, 1 }
  0xd7   :  { %1405 = vpush %v96_v41  ;;  %v222_v16 = vadd.f32 %v221_v10, %v220_v6 }
  0xd8   :  { %1407 = vpush %v1571_v40 }
  0xdf   :  { %v1575_v47 = vpop.eup %1574 }
 0x107   :  { %v183_v42 = vpop.f32.mrf.mxu0 }
 0x108   :  { %s1406_s21 = spop %1405 }
 0x109   :  { %s1408_s22 = spop %1407  ;;  %v1323_v44 = vpop.f32.mrf.mxu0 }
 0x10a   :  { %s103_s23 = smul.f32 %s1408_s22, %s1406_s21 }
 0x10c   :  { %v187_v45 = vstv %s103_s23  ;;  %v306_v51 = vpop.f32.mrf.mxu1 }
 0x10d   :  { %vm188_vm6 = vcmp.gt.f32.partialorder %v183_v42, %v187_v45 }
 0x10e   :  { %vm191_vm7 = vmand %vm188_vm6, %vm190_vm5  ;;  %v1342_v53 = vpop.f32.mrf.mxu1  ;;  %vm800_vm5 = vcmask 64512  }
 0x10f   :  { %v1211_v46 = vsel %vm191_vm7, 1.0, %v1757_v1  ;;  %v608_v53 = vld [vmem:[%s600_s28 + $0x38] sm:$0xff] }
 0x110   :  { %194 = vadd.xlane.f32.xlu0 %v1211_v46  ;;  %1382 = vmatpush3.msra.mxu0 %v608_v53 }
 0x111   :  { %1383 = vmatprep.subr.mxu0 %v1757_v1 }
 0x112   :  { %1384 = vmatpush3.msra.mxu0 %v607_v57 }
 0x113   :  { %1385 = vmatprep.subr.mxu0 %v1757_v1 }
 0x114   :  { %338 = vadd.xlane.f32.xlu0 %v337_v50  ;;  %1386 = vmatpush3.msra.mxu0 %v606_v59 }
 0x115   :  { %1387 = vmatprep.subr.mxu0 %v1757_v1 }
 0x116   :  { %1388 = vmatpush3.msra.mxu0 %v605_v60 }
 0x117   :  { %1389 = vmatprep.subr.mxu0 %v1757_v1 }
 0x118   :  { %461 = vadd.xlane.f32.xlu0 %v460_v23  ;;  %1390 = vmatpush3.msra.mxu0 %v604_v14  ;;  %v697_v23 = vmul.f32 %v1809_v0, %v1809_v0 }
 0x119   :  { %v429_v24 = vpop.f32.mrf.mxu0  ;;  %1391 = vmatprep.subr.mxu0 %v1757_v1 }
 0x11a   :  { %1392 = vmatpush3.msra.mxu0 %v603_v61  ;;  %v698_v25 = vsel %vm68_vm0, %v697_v23, 0.0 }
 0x11b   :  { %v1361_v26 = vpop.f32.mrf.mxu0  ;;  %1393 = vmatprep.subr.mxu0 %v1757_v1 }
 0x11c   :  { %584 = vadd.xlane.f32.xlu0 %v583_v55  ;;  %1394 = vmatpush3.msra.mxu0 %v602_v62 }
 0x11d   :  { %1395 = vmatprep.subr.mxu0 %v1757_v1 }
 0x11e   :  { %v552_v56 = vpop.f32.mrf.mxu1  ;;  %1396 = vmatpush3.msra.mxu0 %v601_v63 }
 0x11f   :  { %1398 = vmatmul.mubr.msk.f32.vlgmr.msra.gmra.mxu0 %vm68_vm0, %v1809_v0 }
 0x120   :  { %v1380_v58 = vpop.f32.mrf.mxu1 }
 0x122   :  { %v767_v26 = vpop.f32.mrf.mxu1 }
 0x124   :  { %v1404_v27 = vpop.f32.mrf.mxu1 }
 0x199   :  { %v195_v3 = vpop.xlane.xlu0 %194 }
 0x19a   :  { %v196_v4 = vrot.slane %v195_v3, 4 }
 0x19c   :  { %v197_v5 = vadd.f32 %v196_v4, %v195_v3 }
 0x19d   :  { %v339_v33 = vpop.xlane.xlu0 %338 }
 0x19e   :  { %v198_v8 = vrot.slane %v197_v5, 2  ;;  %v340_v34 = vrot.slane %v339_v33, 4 }
 0x1a0   :  { %v199_v9 = vadd.f32 %v198_v8, %v197_v5  ;;  %v341_v35 = vadd.f32 %v340_v34, %v339_v33  ;;  %v595_v33 = vstv %s594_s15  ;;  %v773_v34 = vshrl.u32 %v76_v7, 7  ;;  %s1995_s15 = smov 0  }
 0x1a1   :  { %v462_v2 = vpop.xlane.xlu0 %461 }
 0x1a2   :  { %v200_v11 = vrot.slane %v199_v9, 1  ;;  %v342_v37 = vrot.slane %v341_v35, 2  ;;  %v463_v3 = vrot.slane %v462_v2, 4 }
 0x1a4   :  { %v201_v13 = vadd.f32 %v200_v11, %v199_v9  ;;  %v343_v41 = vadd.f32 %v342_v37, %v341_v35  ;;  %v464_v4 = vadd.f32 %v463_v3, %v462_v2 }
 0x1a5   :  { %v585_v30 = vpop.xlane.xlu0 %584 }
 0x1a6   :  { %1409 = vpush %v201_v13  ;;  %v344_v44 = vrot.slane %v343_v41, 1  ;;  %v465_v6 = vrot.slane %v464_v4, 2  ;;  %v586_v31 = vrot.slane %v585_v30, 4 }
 0x1a7   :  { %1411 = vpush %v222_v16 }
 0x1a8   :  { %1413 = vpush %v1573_v15  ;;  %v345_v48 = vadd.f32 %v344_v44, %v343_v41  ;;  %v466_v11 = vadd.f32 %v465_v6, %v464_v4  ;;  %v587_v32 = vadd.f32 %v586_v31, %v585_v30  ;;  %v681_v6 = vstv %s1932_s0 }
 0x1aa   :  { %v467_v16 = vrot.slane %v466_v11, 1  ;;  %v588_v35 = vrot.slane %v587_v32, 2 }
 0x1ac   :  { %v468_v20 = vadd.f32 %v467_v16, %v466_v11 }
 0x1d7   :  { %s1410_s6 = spop %1409 }
 0x1d8   :  { %204 = sst [smem:[#allocation11]] %s1410_s6  ;;  %s1412_s3 = spop %1411 }
 0x1d9   :  { %s1414_s7 = spop %1413  ;;  %s471_s6 = smul.f32 %s470_s5, %s454_s30 }
 0x1da   :  { %s229_s8 = smul.f32 %s1414_s7, %s1412_s3 }
 0x1db   :  { %v472_v5 = vstv %s471_s6 }
 0x1dc   :  { %v310_v18 = vstv %s229_s8  ;;  %1576 = vrcp.f32 %v472_v5  ;;  %v899_v5 = vsel %vm68_vm0, %v1809_v0, -inf }
 0x1dd   :  { %vm311_vm10 = vcmp.gt.f32.partialorder %v306_v51, %v310_v18  ;;  %1578 = vrcp.f32 %v595_v33 }
 0x1de   :  { %vm314_vm11 = vmand %vm311_vm10, %vm313_vm9 }
 0x1df   :  { %v1216_v19 = vsel %vm314_vm11, 1.0, %v1757_v1  ;;  %v1956_v28 = vpop.f32.mrf.mxu0  ;;  %vm682_vm11 = vcmp.lt.s32.totalorder %v1824_v12, %v681_v6 }
 0x1e0   :  { %317 = vadd.xlane.f32.xlu1 %v1216_v19 }
 0x1e1   :  { %v1399_v29 = vpop.f32.mrf.mxu0 }
 0x1e9   :  { %v1577_v19 = vpop.eup %1576 }
 0x1ea   :  { %v1579_v55 = vpop.eup %1578 }
 0x269   :  { %v318_v38 = vpop.xlane.xlu1 %317 }
 0x26a   :  { %v319_v39 = vrot.slane %v318_v38, 4 }
 0x26c   :  { %v320_v40 = vadd.f32 %v319_v39, %v318_v38  ;;  %v774_v38 = vsub.s32 %v1824_v12, %v773_v34 }
 0x26e   :  { %v321_v42 = vrot.slane %v320_v40, 2 }
 0x270   :  { %v322_v43 = vadd.f32 %v321_v42, %v320_v40  ;;  %v589_v40 = vadd.f32 %v588_v35, %v587_v32 }
 0x272   :  { %v323_v45 = vrot.slane %v322_v43, 1 }
 0x274   :  { %v324_v46 = vadd.f32 %v323_v45, %v322_v43  ;;  %v790_v43 = vmul.f32 2.0, %v767_v26 }
 0x276   :  { %1415 = vpush %v324_v46  ;;  %v590_v46 = vrot.slane %v589_v40, 1 }
 0x277   :  { %1417 = vpush %v345_v48 }
 0x278   :  { %1419 = vpush %v1575_v47 }
 0x2a7   :  { %s1416_s20 = spop %1415 }
 0x2a8   :  { %327 = sst [smem:[#allocation11 + $0x1]] %s1416_s20  ;;  %s1418_s21 = spop %1417 }
 0x2a9   :  { %s1420_s22 = spop %1419  ;;  %s871_s20 = smul.u32 %s1929_s25, %s1929_s25 }
 0x2aa   :  { %s352_s23 = smul.f32 %s1420_s22, %s1418_s21  ;;  %s815_s21 = scvt.s32.f32 %s814_s17 }
 0x2ab   :  { %s834_s22 = scvt.s32.f32 %s833_s18  ;;  %s872_s11 = scvt.s32.f32 %s871_s20 }
 0x2ac   :  { %v433_v50 = vstv %s352_s23  ;;  %s853_s23 = scvt.s32.f32 %s852_s19 }
 0x2ad   :  { %vm434_vm14 = vcmp.gt.f32.partialorder %v429_v24, %v433_v50  ;;  %v816_v50 = vstv %s815_s21  ;;  %v873_v57 = vstv %s872_s11 }
 0x2ae   :  { %vm437_vm15 = vmand %vm434_vm14, %vm436_vm13  ;;  %v854_v52 = vstv %s853_s23 }
 0x2af   :  { %v1221_v51 = vsel %vm437_vm15, 1.0, %v1757_v1 }
 0x2b0   :  { %440 = vadd.xlane.f32.xlu1 %v1221_v51  ;;  %v835_v51 = vstv %s834_s22 }
 0x339   :  { %v441_v8 = vpop.xlane.xlu1 %440 }
 0x33a   :  { %v442_v9 = vrot.slane %v441_v8, 4 }
 0x33c   :  { %v443_v10 = vadd.f32 %v442_v9, %v441_v8 }
 0x33e   :  { %v444_v13 = vrot.slane %v443_v10, 2 }
 0x340   :  { %v445_v15 = vadd.f32 %v444_v13, %v443_v10  ;;  %v889_v10 = vsel %vm68_vm0, %v1809_v0, inf }
 0x342   :  { %v446_v17 = vrot.slane %v445_v15, 1 }
 0x344   :  { %v447_v18 = vadd.f32 %v446_v17, %v445_v15 }
 0x346   :  { %1421 = vpush %v447_v18 }
 0x347   :  { %1423 = vpush %v468_v20 }
 0x348   :  { %1425 = vpush %v1577_v19 }
 0x377   :  { %s1422_s3 = spop %1421 }
 0x378   :  { %450 = sst [smem:[#allocation11 + $0x2]] %s1422_s3  ;;  %s1424_s7 = spop %1423 }
 0x379   :  { %s1426_s8 = spop %1425 }
 0x37a   :  { %s475_s10 = smul.f32 %s1426_s8, %s1424_s7  ;;  %s921_s8 = sld [smem:[#allocation2]] }
 0x37c   :  { %v556_v22 = vstv %s475_s10 }
 0x37d   :  { %vm557_vm3 = vcmp.gt.f32.partialorder %v552_v56, %v556_v22  ;;  %v591_v56 = vadd.f32 %v590_v46, %v589_v40 }
 0x37e   :  { %vm560_vm4 = vmand %vm557_vm3, %vm559_vm2 }
 0x37f   :  { %v1226_v24 = vsel %vm560_vm4, 1.0, %v1757_v1 }
 0x380   :  { %563 = vadd.xlane.f32.xlu1 %v1226_v24  ;;  %s922_s10 = scvt.s32.f32 %s921_s8 }
 0x382   :  { %s1244_s14 = sadd.f32 -1.0, %s922_s10 }
 0x384   :  { %699 = vadd.xlane.f32.xlu1 %v698_v25 }
 0x409   :  { %v564_v36 = vpop.xlane.xlu1 %563 }
 0x40a   :  { %v565_v37 = vrot.slane %v564_v36, 4 }
 0x40c   :  { %v566_v39 = vadd.f32 %v565_v37, %v564_v36 }
 0x40d   :  { %v700_v41 = vpop.xlane.xlu1 %699 }
 0x40e   :  { %v567_v7 = vrot.slane %v566_v39, 2  ;;  %v775_v42 = vrot.slane %v700_v41, %v774_v38 }
 0x410   :  { %v568_v44 = vadd.f32 %v567_v7, %v566_v39  ;;  %v789_v45 = vadd.f32 %v775_v42, %v700_v41 }
 0x412   :  { %v569_v47 = vrot.slane %v568_v44, 1  ;;  %v791_v48 = vsub.f32 %v789_v45, %v790_v43 }
 0x414   :  { %v570_v53 = vadd.f32 %v569_v47, %v568_v44  ;;  %v792_v54 = vmax.f32 %v791_v48, 0.0 }
 0x416   :  { %1427 = vpush %v570_v53  ;;  %vm797_vm6 = vcmp.lt.f32.partialorder %v792_v54, %v796_v49  ;;  %vm817_vm7 = vcmp.lt.f32.partialorder %v792_v54, %v816_v50  ;;  %vm836_vm8 = vcmp.lt.f32.partialorder %v792_v54, %v835_v51  ;;  %vm855_vm9 = vcmp.lt.f32.partialorder %v792_v54, %v854_v52 }
 0x417   :  { %1429 = vpush %v591_v56  ;;  %v1234_v58 = vsel %vm797_vm6, 1.0, %v1757_v1  ;;  %v1236_v59 = vsel %vm817_vm7, 1.0, %v1757_v1  ;;  %v1238_v60 = vsel %vm836_vm8, 1.0, %v1757_v1  ;;  %v1240_v14 = vsel %vm855_vm9, 1.0, %v1757_v1 }
 0x418   :  { %1431 = vpush %v1579_v55  ;;  %v801_v61 = vsel %vm800_vm5, %v1234_v58, 0.0  ;;  %v820_v62 = vsel %vm800_vm5, %v1236_v59, 0.0  ;;  %vm874_vm10 = vcmp.lt.f32.partialorder %v792_v54, %v873_v57  ;;  %v839_v63 = vsel %vm800_vm5, %v1238_v60, 0.0 }
 0x419   :  { %802 = vadd.xlane.f32.xlu1 %v801_v61  ;;  %821 = vadd.xlane.f32.xlu0 %v820_v62  ;;  %v858_v2 = vsel %vm800_vm5, %v1240_v14, 0.0  ;;  %v1242_v3 = vsel %vm874_vm10, 1.0, %v1757_v1 }
 0x41a   :  { %v877_v4 = vsel %vm800_vm5, %v1242_v3, 0.0 }
 0x41d   :  { %840 = vadd.xlane.f32.xlu1 %v839_v63  ;;  %859 = vadd.xlane.f32.xlu0 %v858_v2 }
 0x421   :  { %878 = vadd.xlane.f32.xlu1 %v877_v4 }
 0x425   :  { %900 = vmax.xlane.f32.xlu1 %v899_v5  ;;  %v1582_v5 = vld [vmem:[#allocation8] sm:$0xff] }
 0x447   :  { %s1428_s24 = spop %1427 }
 0x448   :  { %573 = sst [smem:[#allocation11 + $0x3]] %s1428_s24  ;;  %s1430_s9 = spop %1429 }
 0x449   :  { %s1432_s25 = spop %1431 }
 0x44a   :  { %s598_s1 = smul.f32 %s1432_s25, %s1430_s9 }
 0x44c   :  { %v679_v8 = vstv %s598_s1 }
 0x44d   :  { %vm680_vm12 = vcmp.gt.f32.partialorder %v1956_v28, %v679_v8 }
 0x44e   :  { %vm683_vm13 = vmand %vm680_vm12, %vm682_vm11 }
 0x44f   :  { %v1231_v9 = vsel %vm683_vm13, 1.0, %v1757_v1 }
 0x450   :  { %686 = vadd.xlane.f32.xlu0 %v1231_v9  ;;  %v923_v9 = vstv %s922_s10 }
 0x454   :  { %890 = vmin.xlane.f32.xlu0 %v889_v10 }
 0x4a2   :  { %v803_v11 = vpop.xlane.xlu1 %802  ;;  %v822_v15 = vpop.xlane.xlu0 %821 }
 0x4a3   :  { %v804_v17 = vrot.slane %v803_v11, 4  ;;  %v823_v19 = vrot.slane %v822_v15, 4 }
 0x4a5   :  { %v805_v22 = vadd.f32 %v804_v17, %v803_v11  ;;  %v824_v24 = vadd.f32 %v823_v19, %v822_v15  ;;  %v928_v15 = vstv %s1244_s14 }
 0x4a6   :  { %v841_v13 = vpop.xlane.xlu1 %840  ;;  %v860_v18 = vpop.xlane.xlu0 %859 }
 0x4a7   :  { %v842_v20 = vrot.slane %v841_v13, 4  ;;  %v861_v12 = vrot.slane %v860_v18, 4  ;;  %v806_v27 = vrot.slane %v805_v22, 2  ;;  %v825_v29 = vrot.slane %v824_v24, 2 }
 0x4a9   :  { %v843_v25 = vadd.f32 %v842_v20, %v841_v13  ;;  %v862_v26 = vadd.f32 %v861_v12, %v860_v18  ;;  %v807_v37 = vadd.f32 %v806_v27, %v805_v22  ;;  %v826_v40 = vadd.f32 %v825_v29, %v824_v24 }
 0x4aa   :  { %v879_v16 = vpop.xlane.xlu1 %878 }
 0x4ab   :  { %v880_v23 = vrot.slane %v879_v16, 4  ;;  %v844_v31 = vrot.slane %v843_v25, 2  ;;  %v863_v33 = vrot.slane %v862_v26, 2  ;;  %v808_v45 = vrot.slane %v807_v37, 1 }
 0x4ac   :  { %v827_v49 = vrot.slane %v826_v40, 1 }
 0x4ad   :  { %v881_v28 = vadd.f32 %v880_v23, %v879_v16  ;;  %v845_v7 = vadd.f32 %v844_v31, %v843_v25  ;;  %v864_v44 = vadd.f32 %v863_v33, %v862_v26  ;;  %v809_v55 = vadd.f32 %v808_v45, %v807_v37 }
 0x4ae   :  { %v901_v21 = vpop.xlane.xlu1 %900  ;;  %v828_v57 = vadd.f32 %v827_v49, %v826_v40 }
 0x4af   :  { %v902_v1 = vrot.slane %v901_v21, 4  ;;  %v882_v35 = vrot.slane %v881_v28, 2  ;;  %v846_v51 = vrot.slane %v845_v7, 1  ;;  %v865_v54 = vrot.slane %v864_v44, 1 }
 0x4b1   :  { %v903_v32 = vmax.f32 %v901_v21, %v902_v1  ;;  %v883_v46 = vadd.f32 %v882_v35, %v881_v28  ;;  %v847_v59 = vadd.f32 %v846_v51, %v845_v7  ;;  %v866_v14 = vadd.f32 %v865_v54, %v864_v44 }
 0x4b3   :  { %v904_v41 = vrot.slane %v903_v32, 2  ;;  %v884_v56 = vrot.slane %v883_v46, 1 }
 0x4b5   :  { %v905_v50 = vmax.f32 %v903_v32, %v904_v41  ;;  %v885_v62 = vadd.f32 %v884_v56, %v883_v46 }
 0x4b7   :  { %v906_v60 = vrot.slane %v905_v50, 1 }
 0x4b9   :  { %v907_v63 = vmax.f32 %v905_v50, %v906_v60 }
 0x4d9   :  { %v687_v0 = vpop.xlane.xlu0 %686 }
 0x4da   :  { %v688_v30 = vrot.slane %v687_v0, 4 }
 0x4dc   :  { %v689_v34 = vadd.f32 %v688_v30, %v687_v0 }
 0x4dd   :  { %v891_v36 = vpop.xlane.xlu0 %890 }
 0x4de   :  { %v690_v38 = vrot.slane %v689_v34, 2  ;;  %v892_v39 = vrot.slane %v891_v36, 4 }
 0x4e0   :  { %v893_v42 = vmin.f32 %v891_v36, %v892_v39  ;;  %v691_v43 = vadd.f32 %v690_v38, %v689_v34 }
 0x4e2   :  { %v894_v47 = vrot.slane %v893_v42, 2  ;;  %v692_v48 = vrot.slane %v691_v43, 1 }
 0x4e4   :  { %v895_v52 = vmin.f32 %v893_v42, %v894_v47  ;;  %v693_v53 = vadd.f32 %v692_v48, %v691_v43 }
 0x4e6   :  { %1433 = vpush %v693_v53  ;;  %v896_v58 = vrot.slane %v895_v52, 1 }
 0x4e7   :  { %1435 = vpush %v809_v55 }
 0x4e8   :  { %1437 = vpush %v828_v57  ;;  %v897_v61 = vmin.f32 %v895_v52, %v896_v58 }
 0x4e9   :  { %1439 = vpush %v847_v59 }
 0x4ea   :  { %1441 = vpush %v866_v14 }
 0x4eb   :  { %1443 = vpush %v885_v62 }
 0x4ec   :  { %1445 = vpush %v897_v61 }
 0x4ed   :  { %1447 = vpush %v907_v63 }
 0x517   :  { %s1434_s0 = spop %1433 }
 0x518   :  { %696 = sst [smem:[#allocation11 + $0x4]] %s1434_s0  ;;  %s1436_s27 = spop %1435 }
 0x519   :  { %812 = sst [smem:[#allocation11 + $0x80]] %s1436_s27  ;;  %s1438_s26 = spop %1437 }
 0x51a   :  { %831 = sst [smem:[#allocation11 + $0x81]] %s1438_s26  ;;  %s1440_s28 = spop %1439 }
 0x51b   :  { %850 = sst [smem:[#allocation11 + $0x82]] %s1440_s28  ;;  %s1442_s29 = spop %1441 }
 0x51c   :  { %869 = sst [smem:[#allocation11 + $0x83]] %s1442_s29  ;;  %s1444_s30 = spop %1443 }
 0x51d   :  { %888 = sst [smem:[#allocation11 + $0x84]] %s1444_s30  ;;  %s1446_s5 = spop %1445 }
 0x51e   :  { %s1448_s6 = spop %1447  ;;  %s1243_s7 = sadd.f32 -1.0, %s1446_s5 }
 0x51f   :  { %s909_s3 = ssub.f32 %s1448_s6, %s1446_s5 }
 0x521   :  { %p910_p1 = scmp.gt.f32.partialorder %s909_s3, 0.0 }
 0x523   :  { %s2101_s3 = smov (!%p910_p1, %s909_s3), 2.0  ;;  %s2103_s5 = smov (!%p910_p1, %s1446_s5), %s1243_s7 }
 0x524   :  { %v914_v2 = vstv %s2101_s3  ;;  %v917_v4 = vstv %s2103_s5 }
 0x525   :  { %1580 = vrcp.f32 %v914_v2  ;;  %v918_v6 = vsub.f32 %v1582_v5, %v917_v4 }
 0x532   :  { %v1581_v3 = vpop.eup %1580 }
 0x533   :  { %1449 = vpush %v1581_v3 }
 0x564   :  { %s1450_s12 = spop %1449 }
 0x565   :  { %v919_v8 = vstv %s1450_s12 }
 0x566   :  { %v1990_v10 = vmul.f32 %v919_v8, %v918_v6 }
 0x568   :  { %v924_v11 = vmul.f32 %v923_v9, %v1990_v10 }
 0x56a   :  { %v925_v13 = vfloor.f32 %v924_v11 }
 0x56c   :  { %v927_v16 = vmax.f32 %v925_v13, 0.0 }
 0x56e   :  { %v929_v17 = vmin.f32 %v928_v15, %v927_v16 }
 0x56f LB: > { %s937_s16 = scvt.s32.f32 %s1717_s15  ;;  %v1759_v19 = vmov 0.0   ;;  %s1760_s18 = smov 1.0   ;;  %s1717_s15 = sphi %s1995_s15, %s935_s15   ;;  %s1713_s13 = sphi %s1993_s13, %s2095_s13  }
 0x570   : > { %s935_s15 = sadd.s32 1, %s1717_s15  }
 0x571   : > { %v938_v18 = vstv %s937_s16  ;;  %p932_p3 = scmp.ge.s32.totalorder %s935_s15, 16  }
 0x572   : > { %vm939_vm14 = vcmp.eq.f32.partialorder %v929_v17, %v938_v18  ;;  %s1246_s23 = sld [smem:[#allocation2 + $0x1]] (%p932_p3)  ;;  %s2012_s25 = smov (%p932_p3), 0.0  }
 0x573   : > { %v1245_v20 = vsel %vm939_vm14, 1.0, %v1759_v19  ;;  %s2014_s1 = smov (%p932_p3), 0  }
 0x574   : > { %v942_v12 = vsel %vm68_vm0, %v1245_v20, 0.0 }
 0x575   : > { %943 = vadd.xlane.f32.xlu0 %v942_v12 }
 0x578   :  { %s966_s24 = scvt.s32.f32 (%p932_p3), %s1246_s23 }
 0x57a   :  { %v967_v29 = vstv (%p932_p3), %s966_s24  ;;  %s1247_s9 = sadd.f32 (%p932_p3), -1.0, %s966_s24 }
 0x57b   :  { %v968_v30 = vmul.f32 (%p932_p3), %v967_v29, %v1990_v10 }
 0x57c   :  { %v972_v32 = vstv (%p932_p3), %s1247_s9 }
 0x57d   :  { %v969_v31 = vfloor.f32 (%p932_p3), %v968_v30 }
 0x57f   :  { %v971_v33 = vmax.f32 (%p932_p3), %v969_v31, 0.0 }
 0x581   :  { %v973_v34 = vmin.f32 (%p932_p3), %v972_v32, %v971_v33 }
 0x5fe   : > { %v944_v21 = vpop.xlane.xlu0 %943 }
 0x5ff   : > { %v945_v22 = vrot.slane %v944_v21, 4 }
 0x601   : > { %v946_v23 = vadd.f32 %v945_v22, %v944_v21 }
 0x603   : > { %v947_v24 = vrot.slane %v946_v23, 2 }
 0x605   : > { %v948_v25 = vadd.f32 %v947_v24, %v946_v23 }
 0x607   : > { %v949_v1 = vrot.slane %v948_v25, 1 }
 0x609   : > { %v950_v26 = vadd.f32 %v949_v1, %v948_v25 }
 0x60b   : > { %1451 = vpush %v950_v26 }
 0x63c   : > { %s1452_s17 = spop %1451 }
 0x63d   : > { %s953_s19 = smax.f32 %s1760_s18, %s1452_s17  ;;  %p952_p2 = scmp.gt.f32.partialorder %s1452_s17, 0.0 }
 0x63e   : > { %v954_v27 = vstv %s953_s19 }
 0x63f   : > { %1583 = vlog2.f32 %v954_v27 }
 0x64c   : > { %v1584_v28 = vpop.eup %1583 }
 0x64d   : > { %v956_v0 = vmul.f32 0.6931472, %v1584_v28 }
 0x64f   : > { %1453 = vpush %v956_v0 }
 0x680   : > { %s1454_s20 = spop %1453 }
 0x681   : > { %s958_s2 = smul.f32 %s1454_s20, %s1452_s17 }
 0x682   :  { %934 = sbr.rel (!%p932_p3) target bundleno = 1391 (0x56f), region = 107 }
 0x683   : > { %s2105_s2 = smov (!%p952_p2, %s958_s2), 0.0 }
 0x684   : > { %s960_s21 = sadd.f32 %s1713_s13, %s2105_s2  }
 0x686   : > { %s2095_s13 = smov %s960_s21  ;;  %s961_s22 = smul.f32 (%p932_p3), 0.001953125, %s960_s21 }
 0x688   :  { %s962_s11 = ssub.f32 6.2383246, %s961_s22 }
 0x68a   :  { %964 = sst [smem:[#allocation11 + $0x100]] %s962_s11 }
 0x68b LB: > { %s981_s0 = scvt.s32.f32 %s1725_s1  ;;  %v1761_v36 = vmov 0.0   ;;  %s1762_s26 = smov 1.0   ;;  %s1725_s1 = sphi %s2014_s1, %s979_s1   ;;  %s1721_s25 = sphi %s2012_s25, %s2096_s25  }
 0x68c   : > { %s979_s1 = sadd.s32 1, %s1725_s1  }
 0x68d   : > { %v982_v35 = vstv %s981_s0  ;;  %p976_p5 = scmp.ge.s32.totalorder %s979_s1, 16  }
 0x68e   : > { %vm983_vm15 = vcmp.eq.f32.partialorder %v973_v34, %v982_v35  ;;  %s1249_s3 = sld [smem:[#allocation2 + $0x2]] (%p976_p5)  ;;  %s2031_s12 = smov (%p976_p5), 0.0  }
 0x68f   : > { %v1248_v37 = vsel %vm983_vm15, 1.0, %v1761_v36  ;;  %s2033_s14 = smov (%p976_p5), 0  }
 0x690   : > { %v986_v38 = vsel %vm68_vm0, %v1248_v37, 0.0 }
 0x691   : > { %987 = vadd.xlane.f32.xlu0 %v986_v38 }
 0x694   :  { %s1010_s8 = scvt.s32.f32 (%p976_p5), %s1249_s3 }
 0x696   :  { %v1011_v48 = vstv (%p976_p5), %s1010_s8  ;;  %s1250_s10 = sadd.f32 (%p976_p5), -1.0, %s1010_s8 }
 0x697   :  { %v1012_v49 = vmul.f32 (%p976_p5), %v1011_v48, %v1990_v10 }
 0x698   :  { %v1016_v51 = vstv (%p976_p5), %s1250_s10 }
 0x699   :  { %v1013_v50 = vfloor.f32 (%p976_p5), %v1012_v49 }
 0x69b   :  { %v1015_v52 = vmax.f32 (%p976_p5), %v1013_v50, 0.0 }
 0x69d   :  { %v1017_v53 = vmin.f32 (%p976_p5), %v1016_v51, %v1015_v52 }
 0x71a   : > { %v988_v39 = vpop.xlane.xlu0 %987 }
 0x71b   : > { %v989_v40 = vrot.slane %v988_v39, 4 }
 0x71d   : > { %v990_v41 = vadd.f32 %v989_v40, %v988_v39 }
 0x71f   : > { %v991_v7 = vrot.slane %v990_v41, 2 }
 0x721   : > { %v992_v42 = vadd.f32 %v991_v7, %v990_v41 }
 0x723   : > { %v993_v43 = vrot.slane %v992_v42, 1 }
 0x725   : > { %v994_v44 = vadd.f32 %v993_v43, %v992_v42 }
 0x727   : > { %1455 = vpush %v994_v44 }
 0x758   : > { %s1456_s27 = spop %1455 }
 0x759   : > { %s997_s28 = smax.f32 %s1762_s26, %s1456_s27  ;;  %p996_p4 = scmp.gt.f32.partialorder %s1456_s27, 0.0 }
 0x75a   : > { %v998_v45 = vstv %s997_s28 }
 0x75b   : > { %1585 = vlog2.f32 %v998_v45 }
 0x768   : > { %v1586_v46 = vpop.eup %1585 }
 0x769   : > { %v1000_v47 = vmul.f32 0.6931472, %v1586_v46 }
 0x76b   : > { %1457 = vpush %v1000_v47 }
 0x79c   : > { %s1458_s29 = spop %1457 }
 0x79d   : > { %s1002_s30 = smul.f32 %s1458_s29, %s1456_s27 }
 0x79e   :  { %978 = sbr.rel (!%p976_p5) target bundleno = 1675 (0x68b), region = 118 }
 0x79f   : > { %s2107_s30 = smov (!%p996_p4, %s1002_s30), 0.0 }
 0x7a0   : > { %s1004_s5 = sadd.f32 %s1721_s25, %s2107_s30  }
 0x7a2   : > { %s2096_s25 = smov %s1004_s5  ;;  %s1005_s6 = smul.f32 (%p976_p5), 0.001953125, %s1004_s5 }
 0x7a4   :  { %s1006_s7 = ssub.f32 6.2383246, %s1005_s6 }
 0x7a6   :  { %1008 = sst [smem:[#allocation11 + $0x101]] %s1006_s7 }
 0x7a7 LB: > { %s1025_s13 = scvt.s32.f32 %s1733_s14  ;;  %v1763_v55 = vmov 0.0   ;;  %s1764_s16 = smov 1.0   ;;  %s1733_s14 = sphi %s2033_s14, %s1023_s14   ;;  %s1729_s12 = sphi %s2031_s12, %s2097_s12  }
 0x7a8   : > { %s1023_s14 = sadd.s32 1, %s1733_s14  }
 0x7a9   : > { %v1026_v54 = vstv %s1025_s13  ;;  %p1020_p7 = scmp.ge.s32.totalorder %s1023_s14, 16  }
 0x7aa   : > { %vm1027_vm1 = vcmp.eq.f32.partialorder %v1017_v53, %v1026_v54  ;;  %s1252_s21 = sld [smem:[#allocation2 + $0x3]] (%p1020_p7)  ;;  %s2050_s24 = smov (%p1020_p7), 0.0  }
 0x7ab   : > { %v1251_v56 = vsel %vm1027_vm1, 1.0, %v1763_v55  ;;  %s2052_s9 = smov (%p1020_p7), 0  }
 0x7ac   : > { %v1030_v57 = vsel %vm68_vm0, %v1251_v56, 0.0 }
 0x7ad   : > { %1031 = vadd.xlane.f32.xlu0 %v1030_v57 }
 0x7b0   :  { %s1054_s23 = scvt.s32.f32 (%p1020_p7), %s1252_s21 }
 0x7b2   :  { %v1055_v5 = vstv (%p1020_p7), %s1054_s23  ;;  %s1253_s11 = sadd.f32 (%p1020_p7), -1.0, %s1054_s23 }
 0x7b3   :  { %v1056_v6 = vmul.f32 (%p1020_p7), %v1055_v5, %v1990_v10 }
 0x7b4   :  { %v1060_v9 = vstv (%p1020_p7), %s1253_s11 }
 0x7b5   :  { %v1057_v8 = vfloor.f32 (%p1020_p7), %v1056_v6 }
 0x7b7   :  { %v1059_v11 = vmax.f32 (%p1020_p7), %v1057_v8, 0.0 }
 0x7b9   :  { %v1061_v13 = vmin.f32 (%p1020_p7), %v1060_v9, %v1059_v11 }
 0x836   : > { %v1032_v58 = vpop.xlane.xlu0 %1031 }
 0x837   : > { %v1033_v59 = vrot.slane %v1032_v58, 4 }
 0x839   : > { %v1034_v60 = vadd.f32 %v1033_v59, %v1032_v58 }
 0x83b   : > { %v1035_v14 = vrot.slane %v1034_v60, 2 }
 0x83d   : > { %v1036_v61 = vadd.f32 %v1035_v14, %v1034_v60 }
 0x83f   : > { %v1037_v62 = vrot.slane %v1036_v61, 1 }
 0x841   : > { %v1038_v63 = vadd.f32 %v1037_v62, %v1036_v61 }
 0x843   : > { %1459 = vpush %v1038_v63 }
 0x874   : > { %s1460_s15 = spop %1459 }
 0x875   : > { %s1041_s17 = smax.f32 %s1764_s16, %s1460_s15  ;;  %p1040_p6 = scmp.gt.f32.partialorder %s1460_s15, 0.0 }
 0x876   : > { %v1042_v2 = vstv %s1041_s17 }
 0x877   : > { %1587 = vlog2.f32 %v1042_v2 }
 0x884   : > { %v1588_v3 = vpop.eup %1587 }
 0x885   : > { %v1044_v4 = vmul.f32 0.6931472, %v1588_v3 }
 0x887   : > { %1461 = vpush %v1044_v4 }
 0x8b8   : > { %s1462_s18 = spop %1461 }
 0x8b9   : > { %s1046_s19 = smul.f32 %s1462_s18, %s1460_s15 }
 0x8ba   :  { %1022 = sbr.rel (!%p1020_p7) target bundleno = 1959 (0x7a7), region = 129 }
 0x8bb   : > { %s2109_s19 = smov (!%p1040_p6, %s1046_s19), 0.0 }
 0x8bc   : > { %s1048_s20 = sadd.f32 %s1729_s12, %s2109_s19  }
 0x8be   : > { %s2097_s12 = smov %s1048_s20  ;;  %s1049_s2 = smul.f32 (%p1020_p7), 0.001953125, %s1048_s20 }
 0x8c0   :  { %s1050_s22 = ssub.f32 6.2383246, %s1049_s2 }
 0x8c2   :  { %1052 = sst [smem:[#allocation11 + $0x102]] %s1050_s22 }
 0x8c3 LB: > { %s1069_s25 = scvt.s32.f32 %s1741_s9  ;;  %v1765_v16 = vmov 0.0   ;;  %s1766_s0 = smov 1.0   ;;  %s1741_s9 = sphi %s2052_s9, %s1067_s9   ;;  %s1737_s24 = sphi %s2050_s24, %s2098_s24  }
 0x8c4   : > { %s1067_s9 = sadd.s32 1, %s1741_s9  }
 0x8c5   : > { %v1070_v15 = vstv %s1069_s25  ;;  %p1064_p9 = scmp.ge.s32.totalorder %s1067_s9, 16  }
 0x8c6   : > { %vm1071_vm2 = vcmp.eq.f32.partialorder %v1061_v13, %v1070_v15  ;;  %s1255_s5 = sld [smem:[#allocation2 + $0x4]] (%p1064_p9)  ;;  %s2069_s8 = smov (%p1064_p9), 0.0  }
 0x8c7   : > { %v1254_v17 = vsel %vm1071_vm2, 1.0, %v1765_v16  ;;  %s2071_s10 = smov (%p1064_p9), 0  }
 0x8c8   : > { %v1074_v18 = vsel %vm68_vm0, %v1254_v17, 0.0 }
 0x8c9   : > { %1075 = vadd.xlane.f32.xlu0 %v1074_v18 }
 0x8cc   :  { %s1098_s3 = scvt.s32.f32 (%p1064_p9), %s1255_s5 }
 0x8ce   :  { %v1099_v27 = vstv (%p1064_p9), %s1098_s3  ;;  %s1256_s7 = sadd.f32 (%p1064_p9), -1.0, %s1098_s3 }
 0x8cf   :  { %v1100_v28 = vmul.f32 (%p1064_p9), %v1099_v27, %v1990_v10 }
 0x8d0   :  { %v1104_v29 = vstv (%p1064_p9), %s1256_s7 }
 0x8d1   :  { %v1101_v0 = vfloor.f32 (%p1064_p9), %v1100_v28 }
 0x8d3   :  { %v1103_v30 = vmax.f32 (%p1064_p9), %v1101_v0, 0.0 }
 0x8d5   :  { %v1105_v31 = vmin.f32 (%p1064_p9), %v1104_v29, %v1103_v30 }
 0x952   : > { %v1076_v19 = vpop.xlane.xlu0 %1075 }
 0x953   : > { %v1077_v20 = vrot.slane %v1076_v19, 4 }
 0x955   : > { %v1078_v12 = vadd.f32 %v1077_v20, %v1076_v19 }
 0x957   : > { %v1079_v21 = vrot.slane %v1078_v12, 2 }
 0x959   : > { %v1080_v22 = vadd.f32 %v1079_v21, %v1078_v12 }
 0x95b   : > { %v1081_v23 = vrot.slane %v1080_v22, 1 }
 0x95d   : > { %v1082_v24 = vadd.f32 %v1081_v23, %v1080_v22 }
 0x95f   : > { %1463 = vpush %v1082_v24 }
 0x990   : > { %s1464_s1 = spop %1463 }
 0x991   : > { %s1085_s27 = smax.f32 %s1766_s0, %s1464_s1  ;;  %p1084_p8 = scmp.gt.f32.partialorder %s1464_s1, 0.0 }
 0x992   : > { %v1086_v25 = vstv %s1085_s27 }
 0x993   : > { %1589 = vlog2.f32 %v1086_v25 }
 0x9a0   : > { %v1590_v1 = vpop.eup %1589 }
 0x9a1   : > { %v1088_v26 = vmul.f32 0.6931472, %v1590_v1 }
 0x9a3   : > { %1465 = vpush %v1088_v26 }
 0x9d4   : > { %s1466_s26 = spop %1465 }
 0x9d5   : > { %s1090_s28 = smul.f32 %s1466_s26, %s1464_s1 }
 0x9d6   :  { %1066 = sbr.rel (!%p1064_p9) target bundleno = 2243 (0x8c3), region = 140 }
 0x9d7   : > { %s2111_s28 = smov (!%p1084_p8, %s1090_s28), 0.0 }
 0x9d8   : > { %s1092_s29 = sadd.f32 %s1737_s24, %s2111_s28  }
 0x9da   : > { %s2098_s24 = smov %s1092_s29  ;;  %s1093_s30 = smul.f32 (%p1064_p9), 0.001953125, %s1092_s29 }
 0x9dc   :  { %s1094_s6 = ssub.f32 6.2383246, %s1093_s30 }
 0x9de   :  { %1096 = sst [smem:[#allocation11 + $0x103]] %s1094_s6 }
 0x9df LB: > { %s1113_s12 = scvt.s32.f32 %s1749_s10  ;;  %v1767_v10 = vmov 0.0   ;;  %s1768_s13 = smov 1.0   ;;  %s1749_s10 = sphi %s2071_s10, %s1111_s10   ;;  %s1745_s8 = sphi %s2069_s8, %s2099_s8  }
 0x9e0   : > { %s1111_s10 = sadd.s32 1, %s1749_s10  }
 0x9e1   : > { %v1114_v32 = vstv %s1113_s12  ;;  %p1108_p11 = scmp.ge.s32.totalorder %s1111_s10, 16  }
 0x9e2   : > { %vm1115_vm3 = vcmp.eq.f32.partialorder %v1105_v31, %v1114_v32  ;;  %s1769_s2 = smov (%p1108_p11), [#allocation11]  }
 0x9e3   : > { %v1257_v33 = vsel %vm1115_vm3, 1.0, %v1767_v10 }
 0x9e4   : > { %v1118_v34 = vsel %vm68_vm0, %v1257_v33, 0.0 }
 0x9e5   : > { %1119 = vadd.xlane.f32.xlu0 %v1118_v34 }
 0xa6e   : > { %v1120_v35 = vpop.xlane.xlu0 %1119 }
 0xa6f   : > { %v1121_v36 = vrot.slane %v1120_v35, 4 }
 0xa71   : > { %v1122_v37 = vadd.f32 %v1121_v36, %v1120_v35 }
 0xa73   : > { %v1123_v38 = vrot.slane %v1122_v37, 2 }
 0xa75   : > { %v1124_v39 = vadd.f32 %v1123_v38, %v1122_v37 }
 0xa77   : > { %v1125_v40 = vrot.slane %v1124_v39, 1 }
 0xa79   : > { %v1126_v41 = vadd.f32 %v1125_v40, %v1124_v39 }
 0xa7b   : > { %1467 = vpush %v1126_v41 }
 0xaac   : > { %s1468_s14 = spop %1467 }
 0xaad   : > { %s1129_s15 = smax.f32 %s1768_s13, %s1468_s14  ;;  %p1128_p10 = scmp.gt.f32.partialorder %s1468_s14, 0.0 }
 0xaae   : > { %v1130_v7 = vstv %s1129_s15 }
 0xaaf   : > { %1591 = vlog2.f32 %v1130_v7 }
 0xabc   : > { %v1592_v42 = vpop.eup %1591 }
 0xabd   : > { %v1132_v43 = vmul.f32 0.6931472, %v1592_v42 }
 0xabf   : > { %1469 = vpush %v1132_v43 }
 0xaf0   : > { %s1470_s16 = spop %1469 }
 0xaf1   : > { %s1134_s17 = smul.f32 %s1470_s16, %s1468_s14 }
 0xaf2   :  { %1110 = sbr.rel (!%p1108_p11) target bundleno = 2527 (0x9df), region = 151 }
 0xaf3   : > { %s2113_s17 = smov (!%p1128_p10, %s1134_s17), 0.0 }
 0xaf4   : > { %s1136_s18 = sadd.f32 %s1745_s8, %s2113_s17  }
 0xaf6   : > { %s2099_s8 = smov %s1136_s18  ;;  %s1137_s19 = smul.f32 (%p1108_p11), 0.001953125, %s1136_s18 }
 0xaf8   :  { %s1138_s20 = ssub.f32 6.2383246, %s1137_s19 }
 0xafa   :  { %1140 = sst [smem:[#allocation11 + $0x104]] %s1138_s20 }
 0xafb   :  { %1148 = dma.smem_to_hbm %s1769_s2, 64, %s2094_s4, [#allocation5]  }
 0xafc   :  { %1709 = dma.done.wait [#allocation5], 64  }
 0xafd   :  { %1710 = vsyncadd [#allocation5], 4294967232 }
 0xafe   :  { %1152 = sfence }
 0xaff   :  { %1153 = vsyncpa [#allocation3], 1 }
 0xb00   :  { %1154 = vsyncpa [#allocation10], 1 }
 0xb01   :  { %1155 = vsyncpa [#allocation4], 1 }
 0xb02   :  { %1156 = vsyncpa [#allocation5], 1 }
 0xb03   :  { %1157 = vsyncpa [#allocation6], 1 }

</bundles_post_ra>
